<compile_context>
chip_gen: v7x
topology: tpu7x:2x2x1
jax: 0.10.0
libtpu: 0.0.40
codegen_flags: <defaults>
</compile_context>

<pallas_src>
import jax
import jax.numpy as jnp
from jax import lax
from jax.experimental import pallas as pl
from jax.experimental.pallas import tpu as pltpu

_MIB = 1024 * 1024


def _round_up(n, m):
    return ((n + m - 1) // m) * m


def _vmem_capacity_bytes():
    """Physical VMEM per TensorCore (64 MiB v7x, 128 MiB v5e/v6e)."""
    try:
        info = pltpu.get_tpu_info()
        for name in ("vmem_capacity_bytes", "vmem_size_bytes", "vmem_bytes"):
            val = getattr(info, name, None)
            if val:
                return int(val)
    except Exception:  # no TPU info available (e.g. CPU tracing)
        pass
    return 64 * _MIB  # conservative default (v7x per-TC)


def _generation_params():
    """(capacity, block budget, scoped-limit cap, min grid steps)."""
    cap = _vmem_capacity_bytes()
    if cap <= 64 * _MIB:                       # v7x-class: 64 MiB/TC, 2 TCs
        return cap, 26 * _MIB, 40 * _MIB, 4
    return cap, 56 * _MIB, 96 * _MIB, 3        # v5e / v6e: 128 MiB/TC


def _per_sample_bytes(Sp, Dp, itemsize):
    # Double-buffered x in + ctx out + attn out, plus in-kernel f32
    # temporaries (xw / A / exp / attn) per in-flight sample.
    io = (2 * Sp * Dp + 2 * Sp * Dp + 2 * Dp * Dp) * itemsize
    tmp = (Sp * Dp + 3 * Dp * Dp) * 4
    return io + tmp


def _pick_block_batch(B, Sp, Dp, itemsize, budget_bytes, min_steps):
    """Largest divisor of B that fits the budget and keeps enough grid steps."""
    per_sample = _per_sample_bytes(Sp, Dp, itemsize)
    fitting = [bt for bt in range(1, B + 1)
               if B % bt == 0 and bt * per_sample <= budget_bytes]
    if not fitting:
        # TODO(synk): a single sample exceeds the budget; an S-tiled reduction
        # schedule (accumulate x^T.xW over S chunks with pl.when init/finalize)
        # is needed for very long sequences. Fall back to 1 sample per step.
        return 1
    preferred = [bt for bt in fitting if B // bt >= min_steps]
    if preferred:
        return max(preferred)
    two_step = [bt for bt in fitting if B // bt >= 2]
    if two_step:
        return max(two_step)
    return max(fitting)


def _make_biaffine_kernel(reassociate):
    def kernel(x_ref, w_ref, b_ref, ctx_ref, attn_ref):
        bt, sp, dp = x_ref.shape
        x = x_ref[...]                     # (Bt, Sp, Dp)
        w = w_ref[...]                     # (Dp, Dp)
        bias = b_ref[...]                  # (1, Dp)

        if reassociate:
            # Sp > Dp: A = (x^T x) @ W -- fewer flops, no (Sp, Dp) temporary.
            gram = lax.dot_general(
                x, x, (((1,), (1,)), ((0,), (0,))),
                preferred_element_type=jnp.float32)               # (Bt, Dp, Dp)
            gram = gram.astype(x.dtype)    # keep 2nd matmul pure-dtype (bf16-safe)
            a = jnp.dot(gram.reshape(bt * dp, dp), w,
                        preferred_element_type=jnp.float32)
            a = a.reshape(bt, dp, dp)
        else:
            # One fused (Bt*Sp, Dp) @ (Dp, Dp) matmul fills the MXU M dim.
            xw = jnp.dot(x.reshape(bt * sp, dp), w,
                         preferred_element_type=jnp.float32)
            xw = xw.astype(x.dtype).reshape(bt, sp, dp)
            # A[b, d, e] = sum_s x[b, s, d] * xw[b, s, e]  (batched, no transpose)
            a = lax.dot_general(
                x, xw, (((1,), (1,)), ((0,), (0,))),
                preferred_element_type=jnp.float32)               # (Bt, Dp, Dp)

        a = a + bias.astype(jnp.float32)   # broadcast over the last axis

        # TODO(synk): attn_mask path (masked_fill with -1e9) not implemented;
        # the PyTorch default (attn_mask=None) skips it.

        # Numerically stable softmax over the last axis.
        m = jnp.max(a, axis=-1, keepdims=True)
        e = jnp.exp(a - m)
        s = jnp.sum(e, axis=-1, keepdims=True)
        # EUP approximate reciprocal + one Newton step -> f32-accurate 1/s with
        # the divide moved off the VPU path.
        r = pl.reciprocal(s, approx=True)
        r = r * (2.0 - s * r)
        attn = (e * r).astype(attn_ref.dtype)
        attn_ref[...] = attn

        # ctx[b, s, e] = sum_d x[b, s, d] * attn[b, e, d]   (x @ attn^T).
        # Reuses the dtype-cast attn so bf16 inputs run a pure-bf16 matmul and
        # ctx is consistent with the returned attn.
        ctx = lax.dot_general(
            x, attn, (((2,), (2,)), ((0,), (0,))),
            preferred_element_type=jnp.float32)                    # (Bt, Sp, Dp)
        ctx_ref[...] = ctx.astype(ctx_ref.dtype)

    return kernel


def _build_call(B, Sp, Dp, dtype, block_batch, vmem_limit, reassociate, cost,
                single_buffer_weights):
    grid_b = B // block_batch
    if single_buffer_weights:
        # Constant index map -> single buffer halves W's VMEM footprint.
        w_spec = pl.BlockSpec((Dp, Dp), lambda i: (0, 0),
                              pipeline_mode=pl.Buffered(1))
        b_spec = pl.BlockSpec((1, Dp), lambda i: (0, 0),
                              pipeline_mode=pl.Buffered(1))
    else:
        w_spec = pl.BlockSpec((Dp, Dp), lambda i: (0, 0))
        b_spec = pl.BlockSpec((1, Dp), lambda i: (0, 0))

    grid_spec = pltpu.PrefetchScalarGridSpec(
        num_scalar_prefetch=0,
        grid=(grid_b,),
        in_specs=[
            pl.BlockSpec((block_batch, Sp, Dp), lambda i: (i, 0, 0)),
            w_spec,
            b_spec,
        ],
        out_specs=[
            pl.BlockSpec((block_batch, Sp, Dp), lambda i: (i, 0, 0)),
            pl.BlockSpec((block_batch, Dp, Dp), lambda i: (i, 0, 0)),
        ],
    )
    return pl.pallas_call(
        _make_biaffine_kernel(reassociate),
        out_shape=(jax.ShapeDtypeStruct((B, Sp, Dp), dtype),
                   jax.ShapeDtypeStruct((B, Dp, Dp), dtype)),
        grid_spec=grid_spec,
        compiler_params=pltpu.CompilerParams(
            dimension_semantics=("parallel",),
            vmem_limit_bytes=vmem_limit,
        ),
        cost_estimate=cost,
    )


def biaffine_self_attention(x, W, b=None, *, block_batch=None):
    """x: (B, S, D); W: (D, D); b: (D,) or None.
    Returns (context (B, S, D), attn (B, D, D)) matching the PyTorch module."""
    B, S, D = x.shape
    dtype = x.dtype
    itemsize = jnp.dtype(dtype).itemsize
    if b is None:
        b = jnp.zeros((D,), dtype)

    # Lane/sublane padding: last dim to a multiple of 128, seq dim to 8, so all
    # stores are lane-dense and in-kernel reshapes are layout-free.  Padded
    # softmax columns are masked via -1e9 in the bias (exp underflows to 0), so
    # the sliced results equal the unpadded math exactly.
    Dp = _round_up(D, 128)
    Sp = _round_up(S, 8)
    pad_d, pad_s = Dp - D, Sp - S

    x_in = jnp.pad(x, ((0, 0), (0, pad_s), (0, pad_d))) if (pad_s or pad_d) else x
    W_in = W.astype(dtype)
    b_in = b.astype(dtype)
    if pad_d:
        W_in = jnp.pad(W_in, ((0, pad_d), (0, pad_d)))
        b_in = jnp.concatenate([b_in, jnp.full((pad_d,), -1e9, dtype=dtype)])
    b2d = b_in.reshape(1, Dp)

    cap, budget, limit_cap, min_steps = _generation_params()
    if block_batch is None:
        block_batch = _pick_block_batch(B, Sp, Dp, itemsize, budget, min_steps)
    assert B % block_batch == 0

    vmem_need = (block_batch * _per_sample_bytes(Sp, Dp, itemsize)
                 + (Dp * Dp + Dp) * itemsize)       # W + bias (single-buffered)
    vmem_limit = int(max(32 * _MIB, min(int(vmem_need * 1.5), limit_cap)))
    if vmem_need > limit_cap:
        # Working set larger than the soft cap (no S tiling yet): give Mosaic as
        # much of the physical VMEM as is safe.
        vmem_limit = int(min(int(vmem_need * 1.25), cap - 8 * _MIB))

    reassociate = Sp > Dp
    if reassociate:
        mm_flops = 2 * Sp * Dp * Dp + 2 * Dp * Dp * Dp   # gram + gram@W
    else:
        mm_flops = 4 * Sp * Dp * Dp                      # x@W + x^T@xW
    flops_per_sample = mm_flops + 2 * Sp * Dp * Dp       # + ctx matmul
    cost = pl.CostEstimate(
        flops=int(B * flops_per_sample),
        transcendentals=int(B * Dp * Dp),
        bytes_accessed=int((2 * B * Sp * Dp + B * Dp * Dp + Dp * Dp + Dp)
                           * itemsize),
    )

    args = (x_in, W_in, b2d)
    try:
        ctx_p, attn_p = _build_call(B, Sp, Dp, dtype, block_batch, vmem_limit,
                                    reassociate, cost,
                                    single_buffer_weights=True)(*args)
    except Exception:
        # Fallback if single-buffered (Buffered(1)) specs are not supported.
        ctx_p, attn_p = _build_call(B, Sp, Dp, dtype, block_batch, vmem_limit,
                                    reassociate, cost,
                                    single_buffer_weights=False)(*args)

    ctx = ctx_p[:, :S, :D] if (pad_s or pad_d) else ctx_p
    attn = attn_p[:, :D, :D] if pad_d else attn_p
    return ctx, attn


def _reference(x, W, b):
    xw = jnp.einsum("ijk,kl->ijl", x, W)
    a = jnp.einsum("ijk,ijl->ikl", x, xw)
    a = a + b[None, None, :]
    attn = jax.nn.softmax(a, axis=2)
    ctx = jnp.einsum("bsd,bed->bse", x, attn)   # x @ attn^T
    return ctx, attn


if __name__ == "__main__":
    B, S, D = 2, 8, 32
    key = jax.random.PRNGKey(0)
    kx, kw = jax.random.split(key)

    x = jax.random.normal(kx, (B, S, D), dtype=jnp.float32)

    # Deterministic parameter init matching nn.init.xavier_uniform_ / zeros_
    bound = (6.0 / (D + D)) ** 0.5
    W = jax.random.uniform(kw, (D, D), minval=-bound, maxval=bound,
                           dtype=jnp.float32)
    bias = jnp.zeros((D,), dtype=jnp.float32)

    ctx, attn = biaffine_self_attention(x, W, bias)
    jax.block_until_ready((ctx, attn))

    ctx_ref, attn_ref = _reference(x, W, bias)
    assert jnp.allclose(ctx, ctx_ref, atol=1e-4, rtol=1e-4)
    assert jnp.allclose(attn, attn_ref, atol=1e-5, rtol=1e-5)

    print("KERNEL_OK")
</pallas_src>

<mosaic_0001>
module attributes {stable_mosaic.version = 11 : i64} {
  func.func @kernel(%arg0: i32, %arg1: memref<1x8x128xf32, #tpu.memory_space<vmem>>, %arg2: memref<128x128xf32, #tpu.memory_space<vmem>>, %arg3: memref<1x128xf32, #tpu.memory_space<vmem>>, %arg4: memref<1x8x128xf32, #tpu.memory_space<vmem>>, %arg5: memref<1x128x128xf32, #tpu.memory_space<vmem>>) attributes {dimension_semantics = [#tpu.dimension_semantics<parallel>], iteration_bounds = array<i64: 2>, scalar_prefetch = 0 : i64, scratch_operands = 0 : i64, tpu.core_type = #tpu.core_type<tc>, window_params = [{transform_indices = @transform_0, window_bounds = array<i64: 1, 8, 128>}, {pipeline_mode = #tpu.pipeline_mode<synchronous>, transform_indices = @transform_1, window_bounds = array<i64: 128, 128>}, {pipeline_mode = #tpu.pipeline_mode<synchronous>, transform_indices = @transform_2, window_bounds = array<i64: 1, 128>}, {transform_indices = @transform_3, window_bounds = array<i64: 1, 8, 128>}, {transform_indices = @transform_4, window_bounds = array<i64: 1, 128, 128>}]} {
    %c0 = arith.constant 0 : index
    %c0_0 = arith.constant 0 : index
    %c0_1 = arith.constant 0 : index
    %0 = vector.load %arg1[%c0, %c0_0, %c0_1] : memref<1x8x128xf32, #tpu.memory_space<vmem>>, vector<1x8x128xf32>
    %c0_2 = arith.constant 0 : index
    %c0_3 = arith.constant 0 : index
    %1 = vector.load %arg2[%c0_2, %c0_3] : memref<128x128xf32, #tpu.memory_space<vmem>>, vector<128x128xf32>
    %c0_4 = arith.constant 0 : index
    %c0_5 = arith.constant 0 : index
    %2 = vector.load %arg3[%c0_4, %c0_5] : memref<1x128xf32, #tpu.memory_space<vmem>>, vector<1x128xf32>
    %3 = vector.shape_cast %0 : vector<1x8x128xf32> to vector<8x128xf32>
    %cst = arith.constant dense<0.000000e+00> : vector<8x128xf32>
    %4 = tpu.matmul %3, %1, %cst {dimension_numbers = #tpu.dot_dimension_numbers<[1], [0], [0], [1], [0, 0, 1, 1], [], []>} : vector<8x128xf32>, vector<128x128xf32>, vector<8x128xf32> -> vector<8x128xf32>
    %5 = vector.shape_cast %4 : vector<8x128xf32> to vector<1x8x128xf32>
    %cst_6 = arith.constant dense<0.000000e+00> : vector<1x128x128xf32>
    %6 = tpu.matmul %0, %5, %cst_6 {dimension_numbers = #tpu.dot_dimension_numbers<[1], [1], [2], [2], [0, 0, 0, 2, 1, 2], [0], [0]>} : vector<1x8x128xf32>, vector<1x8x128xf32>, vector<1x128x128xf32> -> vector<1x128x128xf32>
    %7 = vector.shape_cast %2 : vector<1x128xf32> to vector<1x1x128xf32>
    %8 = vector.broadcast %7 : vector<1x1x128xf32> to vector<1x128x128xf32>
    %9 = arith.addf %6, %8 : vector<1x128x128xf32>
    %cst_7 = arith.constant dense<0xFF800000> : vector<1x128xf32>
    %10 = vector.multi_reduction <maximumf>, %9, %cst_7 [2] : vector<1x128x128xf32> to vector<1x128xf32>
    %11 = vector.shape_cast %10 : vector<1x128xf32> to vector<1x128x1xf32>
    %12 = vector.broadcast %11 : vector<1x128x1xf32> to vector<1x128x128xf32>
    %13 = arith.subf %9, %12 : vector<1x128x128xf32>
    %14 = math.exp %13 : vector<1x128x128xf32>
    %cst_8 = arith.constant dense<0.000000e+00> : vector<1x128xf32>
    %15 = vector.multi_reduction <add>, %14, %cst_8 [2] : vector<1x128x128xf32> to vector<1x128xf32>
    %16 = vector.shape_cast %15 : vector<1x128xf32> to vector<1x128x1xf32>
    %17 = tpu.reciprocal %16 {approx = true} : vector<1x128x1xf32> -> vector<1x128x1xf32>
    %18 = arith.mulf %16, %17 : vector<1x128x1xf32>
    %cst_9 = arith.constant 2.000000e+00 : f32
    %19 = vector.broadcast %cst_9 : f32 to vector<1x128x1xf32>
    %20 = arith.subf %19, %18 : vector<1x128x1xf32>
    %21 = arith.mulf %17, %20 : vector<1x128x1xf32>
    %22 = vector.broadcast %21 : vector<1x128x1xf32> to vector<1x128x128xf32>
    %23 = arith.mulf %14, %22 : vector<1x128x128xf32>
    %c0_10 = arith.constant 0 : index
    %c0_11 = arith.constant 0 : index
    %c0_12 = arith.constant 0 : index
    %24 = vector.load %arg5[%c0_10, %c0_11, %c0_12] : memref<1x128x128xf32, #tpu.memory_space<vmem>>, vector<1x128x128xf32>
    tpu.vector_store %arg5[%c0_10, %c0_11, %c0_12], %23 {strides = array<i32>} : memref<1x128x128xf32, #tpu.memory_space<vmem>>, vector<1x128x128xf32>,
    %cst_13 = arith.constant dense<0.000000e+00> : vector<1x8x128xf32>
    %25 = tpu.matmul %0, %23, %cst_13 {dimension_numbers = #tpu.dot_dimension_numbers<[2], [2], [1], [1], [0, 0, 0, 1, 1, 1], [0], [0]>} : vector<1x8x128xf32>, vector<1x128x128xf32>, vector<1x8x128xf32> -> vector<1x8x128xf32>
    %c0_14 = arith.constant 0 : index
    %c0_15 = arith.constant 0 : index
    %c0_16 = arith.constant 0 : index
    %26 = vector.load %arg4[%c0_14, %c0_15, %c0_16] : memref<1x8x128xf32, #tpu.memory_space<vmem>>, vector<1x8x128xf32>
    tpu.vector_store %arg4[%c0_14, %c0_15, %c0_16], %25 {strides = array<i32>} : memref<1x8x128xf32, #tpu.memory_space<vmem>>, vector<1x8x128xf32>,
    return
  }
  func.func @transform_0(%arg0: i32) -> (i32, i32, i32) {
    %c0_i32 = arith.constant 0 : i32
    %c0_i32_0 = arith.constant 0 : i32
    %c0_i32_1 = arith.constant 0 : i32
    return %arg0, %c0_i32, %c0_i32_0 : i32, i32, i32
  }
  func.func @transform_1(%arg0: i32) -> (i32, i32) {
    %c0_i32 = arith.constant 0 : i32
    %c0_i32_0 = arith.constant 0 : i32
    %c0_i32_1 = arith.constant 0 : i32
    return %c0_i32, %c0_i32_0 : i32, i32
  }
  func.func @transform_2(%arg0: i32) -> (i32, i32) {
    %c0_i32 = arith.constant 0 : i32
    %c0_i32_0 = arith.constant 0 : i32
    %c0_i32_1 = arith.constant 0 : i32
    return %c0_i32, %c0_i32_0 : i32, i32
  }
  func.func @transform_3(%arg0: i32) -> (i32, i32, i32) {
    %c0_i32 = arith.constant 0 : i32
    %c0_i32_0 = arith.constant 0 : i32
    %c0_i32_1 = arith.constant 0 : i32
    return %arg0, %c0_i32, %c0_i32_0 : i32, i32, i32
  }
  func.func @transform_4(%arg0: i32) -> (i32, i32, i32) {
    %c0_i32 = arith.constant 0 : i32
    %c0_i32_0 = arith.constant 0 : i32
    %c0_i32_1 = arith.constant 0 : i32
    return %arg0, %c0_i32, %c0_i32_0 : i32, i32, i32
  }
}

module attributes {stable_mosaic.version = 11 : i64} {
  func.func @kernel(%arg0: i32, %arg1: memref<1x8x128xf32, #tpu.memory_space<vmem>>, %arg2: memref<128x128xf32, #tpu.memory_space<vmem>>, %arg3: memref<1x128xf32, #tpu.memory_space<vmem>>, %arg4: memref<1x8x128xf32, #tpu.memory_space<vmem>>, %arg5: memref<1x128x128xf32, #tpu.memory_space<vmem>>) attributes {dimension_semantics = [#tpu.dimension_semantics<parallel>], iteration_bounds = array<i64: 2>, scalar_prefetch = 0 : i64, scratch_operands = 0 : i64, tpu.core_type = #tpu.core_type<tc>, window_params = [{transform_indices = @transform_0, window_bounds = array<i64: 1, 8, 128>}, {pipeline_mode = #tpu.pipeline_mode<synchronous>, transform_indices = @transform_1, window_bounds = array<i64: 128, 128>}, {pipeline_mode = #tpu.pipeline_mode<synchronous>, transform_indices = @transform_2, window_bounds = array<i64: 1, 128>}, {transform_indices = @transform_3, window_bounds = array<i64: 1, 8, 128>}, {transform_indices = @transform_4, window_bounds = array<i64: 1, 128, 128>}]} {
    %c0 = arith.constant 0 : index
    %c0_0 = arith.constant 0 : index
    %c0_1 = arith.constant 0 : index
    %0 = vector.load %arg1[%c0, %c0_0, %c0_1] : memref<1x8x128xf32, #tpu.memory_space<vmem>>, vector<1x8x128xf32>
    %c0_2 = arith.constant 0 : index
    %c0_3 = arith.constant 0 : index
    %1 = vector.load %arg2[%c0_2, %c0_3] : memref<128x128xf32, #tpu.memory_space<vmem>>, vector<128x128xf32>
    %c0_4 = arith.constant 0 : index
    %c0_5 = arith.constant 0 : index
    %2 = vector.load %arg3[%c0_4, %c0_5] : memref<1x128xf32, #tpu.memory_space<vmem>>, vector<1x128xf32>
    %3 = vector.shape_cast %0 : vector<1x8x128xf32> to vector<8x128xf32>
    %cst = arith.constant dense<0.000000e+00> : vector<8x128xf32>
    %4 = tpu.matmul %3, %1, %cst {dimension_numbers = #tpu.dot_dimension_numbers<[1], [0], [0], [1], [0, 0, 1, 1], [], []>} : vector<8x128xf32>, vector<128x128xf32>, vector<8x128xf32> -> vector<8x128xf32>
    %5 = vector.shape_cast %4 : vector<8x128xf32> to vector<1x8x128xf32>
    %cst_6 = arith.constant dense<0.000000e+00> : vector<1x128x128xf32>
    %6 = tpu.matmul %0, %5, %cst_6 {dimension_numbers = #tpu.dot_dimension_numbers<[1], [1], [2], [2], [0, 0, 0, 2, 1, 2], [0], [0]>} : vector<1x8x128xf32>, vector<1x8x128xf32>, vector<1x128x128xf32> -> vector<1x128x128xf32>
    %7 = vector.shape_cast %2 : vector<1x128xf32> to vector<1x1x128xf32>
    %8 = vector.broadcast %7 : vector<1x1x128xf32> to vector<1x128x128xf32>
    %9 = arith.addf %6, %8 : vector<1x128x128xf32>
    %cst_7 = arith.constant dense<0xFF800000> : vector<1x128xf32>
    %10 = vector.multi_reduction <maximumf>, %9, %cst_7 [2] : vector<1x128x128xf32> to vector<1x128xf32>
    %11 = vector.shape_cast %10 : vector<1x128xf32> to vector<1x128x1xf32>
    %12 = vector.broadcast %11 : vector<1x128x1xf32> to vector<1x128x128xf32>
    %13 = arith.subf %9, %12 : vector<1x128x128xf32>
    %14 = math.exp %13 : vector<1x128x128xf32>
    %cst_8 = arith.constant dense<0.000000e+00> : vector<1x128xf32>
    %15 = vector.multi_reduction <add>, %14, %cst_8 [2] : vector<1x128x128xf32> to vector<1x128xf32>
    %16 = vector.shape_cast %15 : vector<1x128xf32> to vector<1x128x1xf32>
    %17 = tpu.reciprocal %16 {approx = true} : vector<1x128x1xf32> -> vector<1x128x1xf32>
    %18 = arith.mulf %16, %17 : vector<1x128x1xf32>
    %cst_9 = arith.constant 2.000000e+00 : f32
    %19 = vector.broadcast %cst_9 : f32 to vector<1x128x1xf32>
    %20 = arith.subf %19, %18 : vector<1x128x1xf32>
    %21 = arith.mulf %17, %20 : vector<1x128x1xf32>
    %22 = vector.broadcast %21 : vector<1x128x1xf32> to vector<1x128x128xf32>
    %23 = arith.mulf %14, %22 : vector<1x128x128xf32>
    %c0_10 = arith.constant 0 : index
    %c0_11 = arith.constant 0 : index
    %c0_12 = arith.constant 0 : index
    %24 = vector.load %arg5[%c0_10, %c0_11, %c0_12] : memref<1x128x128xf32, #tpu.memory_space<vmem>>, vector<1x128x128xf32>
    tpu.vector_store %arg5[%c0_10, %c0_11, %c0_12], %23 {strides = array<i32>} : memref<1x128x128xf32, #tpu.memory_space<vmem>>, vector<1x128x128xf32>,
    %cst_13 = arith.constant dense<0.000000e+00> : vector<1x8x128xf32>
    %25 = tpu.matmul %0, %23, %cst_13 {dimension_numbers = #tpu.dot_dimension_numbers<[2], [2], [1], [1], [0, 0, 0, 1, 1, 1], [0], [0]>} : vector<1x8x128xf32>, vector<1x128x128xf32>, vector<1x8x128xf32> -> vector<1x8x128xf32>
    %c0_14 = arith.constant 0 : index
    %c0_15 = arith.constant 0 : index
    %c0_16 = arith.constant 0 : index
    %26 = vector.load %arg4[%c0_14, %c0_15, %c0_16] : memref<1x8x128xf32, #tpu.memory_space<vmem>>, vector<1x8x128xf32>
    tpu.vector_store %arg4[%c0_14, %c0_15, %c0_16], %25 {strides = array<i32>} : memref<1x8x128xf32, #tpu.memory_space<vmem>>, vector<1x8x128xf32>,
    return
  }
  func.func @transform_0(%arg0: i32) -> (i32, i32, i32) {
    %c0_i32 = arith.constant 0 : i32
    %c0_i32_0 = arith.constant 0 : i32
    %c0_i32_1 = arith.constant 0 : i32
    return %arg0, %c0_i32, %c0_i32_0 : i32, i32, i32
  }
  func.func @transform_1(%arg0: i32) -> (i32, i32) {
    %c0_i32 = arith.constant 0 : i32
    %c0_i32_0 = arith.constant 0 : i32
    %c0_i32_1 = arith.constant 0 : i32
    return %c0_i32, %c0_i32_0 : i32, i32
  }
  func.func @transform_2(%arg0: i32) -> (i32, i32) {
    %c0_i32 = arith.constant 0 : i32
    %c0_i32_0 = arith.constant 0 : i32
    %c0_i32_1 = arith.constant 0 : i32
    return %c0_i32, %c0_i32_0 : i32, i32
  }
  func.func @transform_3(%arg0: i32) -> (i32, i32, i32) {
    %c0_i32 = arith.constant 0 : i32
    %c0_i32_0 = arith.constant 0 : i32
    %c0_i32_1 = arith.constant 0 : i32
    return %arg0, %c0_i32, %c0_i32_0 : i32, i32, i32
  }
  func.func @transform_4(%arg0: i32) -> (i32, i32, i32) {
    %c0_i32 = arith.constant 0 : i32
    %c0_i32_0 = arith.constant 0 : i32
    %c0_i32_1 = arith.constant 0 : i32
    return %arg0, %c0_i32, %c0_i32_0 : i32, i32, i32
  }
}

</mosaic_0001>

<bundles_post_ra>
// kernel: tpu_custom_call.1
= control target key start
LH: loop header
LB: loop body
LE: loop exit
PB: predicated region body
PF: predicated region fallthrough
CT: control target
= control target key end

     0   :  { %10 = vsyncpa [#allocation3], 0  ;;  %s1935_s0 = inlined_call_operand.hbm [shape: f32[2,8,128], index: 0, kind: input, shape index: {}]   ;;  %s1936_s1 = inlined_call_operand.hbm [shape: f32[128,128], index: 1, kind: input, shape index: {}]   ;;  %s1937_s2 = inlined_call_operand.vmem [shape: f32[1,128], index: 2, kind: input, shape index: {}]   ;;  %s1938_s3 = inlined_call_operand.hbm [shape: f32[2,8,128], index: 3, kind: output, shape index: {0}]   ;;  %s1939_s4 = inlined_call_operand.hbm [shape: f32[2,128,128], index: 4, kind: output, shape index: {1}]  }
   0x1   :  { %12 = vsyncpa [#allocation3 + $0x1], 0 }
   0x2   :  { %13 = vsyncpa [#allocation6], 0 }
   0x3   :  { %14 = vsyncpa [#allocation4], 0 }
   0x4   :  { %16 = vsyncpa [#allocation4 + $0x1], 0 }
   0x5   :  { %17 = vsyncpa [#allocation9], 0 }
   0x6   :  { %19 = vsyncpa [#allocation9 + $0x1], 0  ;;  %s1547_s15 = smov 0   ;;  %s1549_s16 = smov 0  }
   0x7   :  { %s1551_s17 = smov 0   ;;  %s1553_s18 = smov 0  }
   0x8 LB: > { %s1568_s19 = sadd.s32 4294967295, %s1509_s18   ;;  %s985_s20 = sadd.s32 4294967294, %s1509_s18   ;;  %s1509_s18 = sphi %s1553_s18, %s1959_s18   ;;  %s1505_s17 = sphi %s1551_s17, %s1958_s17   ;;  %s1501_s16 = sphi %s1549_s16, %s1957_s16   ;;  %s1497_s15 = sphi %s1547_s15, %s1956_s15  }
   0x9   : > { %p45_p0 = scmp.ne.s32.totalorder %s1501_s16, %s1497_s15  ;;  %p1940_p1 = scmp.eq.s32.totalorder %s1568_s19, 0 }
   0xa   : > { %p117_p3 = scmp.eq.s32.totalorder %s985_s20, 1  ;;  %p986_p5 = scmp.ge.s32.totalorder %s1509_s18, 1 }
   0xb   : > { %p1577_p4 = por %p1940_p1, %p45_p0  ;;  %p150_p7 = scmp.lt.s32.totalorder %s1509_s18, 3 }
   0xc   : > { %p1582_p6 = por %p117_p3, %p45_p0  ;;  %s1511_s24 = smov [#allocation5]  }
   0xd   : > { %s1943_s21 = scalar_select %p1577_p4, 1, 0 }
   0xe   : > { %s1944_s22 = scalar_select %p1582_p6, 1, 0 }
   0xf   : > { %p1587_p8 = pnand %p986_p5, %p150_p7  ;;  %s162_s25 = sshll.u32 %s1511_s24, 4  ;;  %s1591_s25 = int_to_ptr.vmem [resolvable:$true] %s162_s25 }
  0x10   : > { %s1603_s27 = sadd.s32 1, %s1509_s18   ;;  %s32_s28 = sadd.s32 1, %s1505_s17 }
  0x11   : > { %s1945_s23 = scalar_select %p1587_p8, 1, 0 }
  0x12   : > { %p1226_p9 = pneg %p1587_p8  ;;  %s29_s29 = ssub.s32 %s1509_s18, %s1603_s27 }
  0x13   : > { %s1349_s6 = scalar_lea.hbm %s1936_s1, 2048 }
  0x14   : > { %p1598_p11 = pnand %p1226_p9, %p1940_p1  ;;  %p1350_p12 = scmp.ne.s32.totalorder %s1936_s1, %s1349_s6 }
  0x15   : > { %p1356_p5 = scmp.lt.u32.totalorder %s1349_s6, %s1936_s1 }
  0x16   : > { %p1351_p13 = pneg %p1598_p11 }
  0x18   : > { %p1352_p0 = pnand %p1351_p13, %p1350_p12 }
  0x1a   : > { %p1353_p3 = pneg %p1352_p0 }
  0x1c   : > { %p1358_p7 = pnand %p1356_p5, %p1353_p3 }
  0x1e   : > { %1361 = shalt.err (!%p1358_p7)
}
  0x1f   : > { %s1362_s11 = scalar_lea.vmem %s1591_s25, 2048  ;;  %p1370_p2 = scmp.lt.s32.totalorder %s1591_s25, %s1591_s25 }
  0x20   : > { %p1363_p9 = scmp.ne.s32.totalorder %s1591_s25, %s1362_s11  ;;  %p1371_p6 = scmp.lt.s32.totalorder %s1362_s11, %s1362_s11 }
  0x22   : > { %p1365_p10 = pnand %p1363_p9, %p1351_p13  ;;  %p1372_p4 = por %p1371_p6, %p1370_p2 }
  0x24   : > { %p1366_p1 = pneg %p1365_p10 }
  0x26   : > { %p1373_p8 = pnand %p1372_p4, %p1366_p1 }
  0x28   : > { %1376 = shalt.err (!%p1373_p8)
}
  0x29   : > { %s1512_s12 = smov 128   ;;  %s1513_s13 = smov 8  }
  0x2a   : > { %1229 = dma.hbm_to_vmem [thread:$0]  (!%p1598_p11), %s1936_s1, 2048, %s1591_s25, [#allocation6], %s1512_s12, %s1512_s12, %s1513_s13  }
  0x2b   : > { %p30_p2 = scmp.eq.s32.totalorder %s29_s29, 0  ;;  %p39_p1 = scmp.ne.s32.totalorder %s1505_s17, %s1501_s16 }
  0x2c   : > { %p40_p4 = scmp.eq.s32.totalorder %s1509_s18, 0  ;;  %p1242_p6 = scmp.lt.s32.totalorder %s1509_s18, 2 }
  0x2d   : > { %s1634_s24 = scalar_select %p30_p2, %s1505_s17, %s32_s28  }
  0x2e   : > { %p41_p8 = por %p40_p4, %p39_p1  ;;  %p1947_p10 = scmp.eq.s32.totalorder %s1568_s19, 1 }
  0x2f   : > { %s179_s5 = sand.u32 1, %s1505_s17   ;;  %s990_s6 = sshll.u32 %s1509_s18, 7 }
  0x30   : > { %p1638_p12 = por %p1947_p10, %p39_p1  ;;  %s989_s7 = sshll.u32 %s179_s5, 3 }
  0x31   : > { %s1647_s9 = scalar_lea.hbm %s1935_s0, %s990_s6  ;;  %s183_s25 = scalar_lea.vmem [#allocation2], %s989_s7 }
  0x32   : > { %s190_s28 = sshll.u32 %s183_s25, 4  ;;  %p1649_p11 = pnand %p1242_p6, %p41_p8  ;;  %s1653_s28 = int_to_ptr.vmem [resolvable:$true] %s190_s28 }
  0x33   : > { %s180_s10 = scalar_lea.sflag [#allocation3], %s179_s5  ;;  %s1377_s11 = scalar_lea.hbm %s1647_s9, 128 }
  0x34   : > { %p1378_p13 = scmp.ne.s32.totalorder %s1647_s9, %s1377_s11  ;;  %p1379_p0 = pneg %p1649_p11 }
  0x35   : > { %s1382_s14 = scalar_lea.hbm %s1935_s0, 256  ;;  %p1383_p7 = scmp.lt.u32.totalorder %s1647_s9, %s1935_s0 }
  0x36   : > { %p1380_p3 = pnand %p1379_p0, %p1378_p13  ;;  %p1384_p9 = scmp.lt.u32.totalorder %s1382_s14, %s1377_s11 }
  0x37   : > { %p1386_p1 = scmp.lt.u32.totalorder %s1377_s11, %s1647_s9 }
  0x38   : > { %p1381_p5 = pneg %p1380_p3  ;;  %p1385_p2 = por %p1384_p9, %p1383_p7 }
  0x3a   : > { %p1387_p4 = por %p1386_p1, %p1385_p2 }
  0x3c   : > { %p1388_p6 = pnand %p1387_p4, %p1381_p5 }
  0x3e   : > { %1391 = shalt.err (!%p1388_p6)
}
  0x3f   : > { %s1392_s5 = scalar_lea.vmem %s1653_s28, 128  ;;  %s1514_s7 = smov [#allocation2]  }
  0x40   : > { %p1393_p8 = scmp.ne.s32.totalorder %s1653_s28, %s1392_s5  ;;  %s1397_s26 = sshll.u32 %s1514_s7, 4  ;;  %s1398_s26 = int_to_ptr.vmem [resolvable:$false] %s1397_s26 }
  0x41   : > { %s1399_s8 = scalar_lea.vmem %s1398_s26, 256  ;;  %p1400_p3 = scmp.lt.s32.totalorder %s1653_s28, %s1398_s26 }
  0x42   : > { %p1395_p10 = pnand %p1393_p8, %p1379_p0  ;;  %p1401_p7 = scmp.lt.s32.totalorder %s1399_s8, %s1392_s5 }
  0x44   : > { %p1396_p13 = pneg %p1395_p10  ;;  %p1402_p9 = por %p1401_p7, %p1400_p3 }
  0x46   : > { %p1403_p2 = pnand %p1402_p9, %p1396_p13 }
  0x48   : > { %1406 = shalt.err (!%p1403_p2)
}
  0x49   : > { %1233 = dma.hbm_to_vmem [thread:$0]  (!%p1649_p11), %s1647_s9, 128, %s1653_s28, %s180_s10  }
  0x4a   : > { %p1950_p5 = scmp.ne.s32.totalorder %s1945_s23, 0 }
  0x4b   : > { %s1683_s25 = sand.u32 (!%p1950_p5), 1, %s1501_s16   ;;  %p1951_p0 = scmp.ne.s32.totalorder (!%p1950_p5), %s1943_s21, 0 }
  0x4c   : > { %199 = sbr.rel (%p1950_p5) target bundleno = 1162 (0x48a), region = 32  ;;  %s992_s11 = sshll.u32 (!%p1950_p5), %s1683_s25, 3 }
  0x4d   : > { %s202_s12 = scalar_lea.sflag (!%p1950_p5), [#allocation3], %s1683_s25  ;;  %s205_s13 = scalar_lea.vmem (!%p1950_p5), [#allocation2], %s992_s11 }
  0x53   : > { %1480 = dma.done.wait (%p1951_p0), %s202_s12, 128  }
  0x54   : > { %1482 = vsyncadd (%p1951_p0), %s202_s12, 4294967168  ;;  %p1952_p11 = scmp.eq.s32.totalorder %s1568_s19, 0 }
  0x56   : > { %1484 = dma.done.wait (%p1952_p11), [#allocation6], 2048   ;;  %p1953_p1 = pmov %p1952_p11 }
  0x57   : > { %v1515_v0 = vmov 0.0|0.0   ;;  %vm1516_vm0 = vmmov 0   ;;  %v1517_v1 = vmov 0.0   ;;  %v240_v2 = vld [vmem:[#allocation5] sm:$0xff]  ;;  %v241_v3 = vld [vmem:[#allocation5 + $0x8] sm:$0xff]  ;;  %v242_v4 = vld [vmem:[#allocation5 + $0x10] sm:$0xff] }
  0x58   : > { %1486 = vsyncadd (%p1953_p1), [#allocation6], 4294965248  ;;  %1168 = vmatprep.subr.bf16.mxu0 %v1515_v0  ;;  %1104 = vmatprep.mubr.msk.f32.mxu0 %vm1516_vm0, %v1517_v1  ;;  %v1169_v5 = vpack.c.bf16 %v241_v3, %v240_v2  ;;  %v243_v6 = vld [vmem:[#allocation5 + $0x18] sm:$0xff]  ;;  %v244_v8 = vld [vmem:[#allocation5 + $0x20] sm:$0xff]  ;;  %vm365_vm1 = vcmask 64512   ;;  %s995_s9 = sshll.u32 %s1683_s25, 7 }
  0x59   : > { %1192 = vmatprep.subr.bf16.mxu1 %v1515_v0  ;;  %1165 = vmatprep.mubr.msk.f32.mxu1 %vm1516_vm0, %v1517_v1  ;;  %v1172_v7 = vpack.c.bf16 %v243_v6, %v242_v4  ;;  %v245_v9 = vld [vmem:[#allocation5 + $0x28] sm:$0xff]  ;;  %v1700_v10 = vld [vmem:[%s205_s13] sm:$0xff]  ;;  %v248_v15 = vld [vmem:[#allocation5 + $0x40] sm:$0xff]  ;;  %s1811_s28 = scalar_lea.vmem [#allocation8], %s995_s9  ;;  %s1020_s29 = sshll.u32 %s1568_s19, 11 }
  0x5a   : > { %1170 = vmatpush3.bf16.msra.mxu0 %v1169_v5  ;;  %333 = vxpose.xlu0.b32.start.end [1/1] (short) %v1700_v10, 128  ;;  %v1175_v11 = vpack.c.bf16 %v245_v9, %v244_v8  ;;  %v246_v12 = vld [vmem:[#allocation5 + $0x30] sm:$0xff]  ;;  %v247_v13 = vld [vmem:[#allocation5 + $0x38] sm:$0xff]  ;;  %v249_v16 = vld [vmem:[#allocation5 + $0x48] sm:$0xff]  ;;  %s870_s10 = sshll.u32 %s1811_s28, 4  ;;  %s1857_s6 = scalar_lea.hbm %s1939_s4, %s1020_s29  ;;  %s1859_s10 = int_to_ptr.vmem [resolvable:$true] %s870_s10 }
  0x5b   : > { %1171 = vmatprep.subr.bf16.mxu0 %v1515_v0  ;;  %v1178_v14 = vpack.c.bf16 %v247_v13, %v246_v12  ;;  %v1181_v17 = vpack.c.bf16 %v249_v16, %v248_v15  ;;  %v250_v18 = vld [vmem:[#allocation5 + $0x50] sm:$0xff]  ;;  %v251_v19 = vld [vmem:[#allocation5 + $0x58] sm:$0xff]  ;;  %v252_v21 = vld [vmem:[#allocation5 + $0x60] sm:$0xff]  ;;  %s844_s5 = scalar_lea.sflag [#allocation9], %s1683_s25  ;;  %s1407_s7 = scalar_lea.vmem %s1859_s10, 2048 }
  0x5c   : > { %v1184_v20 = vpack.c.bf16 %v251_v19, %v250_v18  ;;  %v253_v22 = vld [vmem:[#allocation5 + $0x68] sm:$0xff]  ;;  %v254_v24 = vld [vmem:[#allocation5 + $0x70] sm:$0xff]  ;;  %v255_v25 = vld [vmem:[#allocation5 + $0x78] sm:$0xff]  ;;  %p1408_p4 = scmp.ne.s32.totalorder %s1859_s10, %s1407_s7  ;;  %s1518_s26 = smov [#allocation8]  }
  0x5d   : > { %v1187_v23 = vpack.c.bf16 %v253_v22, %v252_v21  ;;  %v1190_v26 = vpack.c.bf16 %v255_v25, %v254_v24  ;;  %v996_v45 = vld [vmem:[%s1937_s2] ss:$0 sm:$0xff]  ;;  %s1411_s8 = sshll.u32 %s1518_s26, 4  ;;  %s1412_s8 = int_to_ptr.vmem [resolvable:$false] %s1411_s8 }
  0x5e   : > { %1173 = vmatpush3.bf16.msra.mxu0 %v1172_v7  ;;  %p1409_p6 = pnand %p1408_p4, %p1638_p12  ;;  %s1413_s12 = scalar_lea.vmem %s1412_s8, 4096 }
  0x5f   : > { %1174 = vmatprep.subr.bf16.mxu0 %v1515_v0  ;;  %p1414_p10 = scmp.lt.s32.totalorder %s1859_s10, %s1412_s8  ;;  %p1415_p13 = scmp.lt.s32.totalorder %s1413_s12, %s1407_s7 }
  0x60   : > { %p1410_p8 = pneg %p1409_p6 }
  0x61   : > { %p1416_p3 = por %p1415_p13, %p1414_p10 }
  0x62   : > { %1176 = vmatpush3.bf16.msra.mxu0 %v1175_v11 }
  0x63   : > { %1177 = vmatprep.subr.bf16.mxu0 %v1515_v0  ;;  %p1417_p7 = pnand %p1416_p3, %p1410_p8 }
  0x66   : > { %1179 = vmatpush3.bf16.msra.mxu0 %v1178_v14 }
  0x67   : > { %1180 = vmatprep.subr.bf16.mxu0 %v1515_v0 }
  0x6a   : > { %1182 = vmatpush3.bf16.msra.mxu0 %v1181_v17 }
  0x6b   : > { %1183 = vmatprep.subr.bf16.mxu0 %v1515_v0 }
  0x6e   : > { %1185 = vmatpush3.bf16.msra.mxu0 %v1184_v20 }
  0x6f   : > { %1186 = vmatprep.subr.bf16.mxu0 %v1515_v0 }
  0x72   : > { %1188 = vmatpush3.bf16.msra.mxu0 %v1187_v23 }
  0x73   : > { %1189 = vmatprep.subr.bf16.mxu0 %v1515_v0 }
  0x76   : > { %1191 = vmatpush3.bf16.msra.mxu0 %v1190_v26 }
  0x79   : > { %1105 = vmatmul.mubr.f32.vlgmr.msra.gmra.mrb[0].mxu0 %v1700_v10 }
  0xda   : > { %v349_v27 = vpop.trf.xlu0 }
  0xdb   : > { %1109 = vmatprep.mubr.msk.f32.mxu0 %vm365_vm1, %v349_v27 }
  0xde   : > { %v350_v28 = vpop.trf.xlu0 }
  0xe2   : > { %v351_v29 = vpop.trf.xlu0 }
  0xe6   : > { %v352_v30 = vpop.trf.xlu0 }
  0xea   : > { %v353_v31 = vpop.trf.xlu0 }
  0xee   : > { %v354_v32 = vpop.trf.xlu0 }
  0xf2   : > { %v355_v33 = vpop.trf.xlu0 }
  0xf6   : > { %v356_v34 = vpop.trf.xlu0 }
  0xfa   : > { %v357_v35 = vpop.trf.xlu0 }
  0xfe   : > { %v358_v36 = vpop.trf.xlu0 }
 0x102   : > { %v359_v37 = vpop.trf.xlu0 }
 0x106   : > { %v360_v40 = vpop.trf.xlu0 }
 0x10a   : > { %v361_v41 = vpop.trf.xlu0 }
 0x10e   : > { %v362_v42 = vpop.trf.xlu0 }
 0x112   : > { %v363_v43 = vpop.trf.xlu0 }
 0x116   : > { %v364_v44 = vpop.trf.xlu0 }
 0x14c   : > { %v323_v38 = vpop.f32.mrb[0].mxu0 }
 0x14d   : > { %v1106_v39 = vpop.f32.mrb[1].mxu0  ;;  %1107 = vmatprep.subr.mxu0 %v323_v38 }
 0x14e   : > { %1108 = vmatpush3.msra.mxu0 %v323_v38 }
 0x14f   : > { %1110 = vmatmul.mubr.msk.f32.vlgmr.msra.gmra.mrb[2].mxu0 %vm365_vm1, %v350_v28 }
 0x150   : > { %1112 = vmatprep.mubr.msk.f32.mxu0 %vm365_vm1, %v351_v29 }
 0x153   : > { %1113 = vmatmul.mubr.msk.f32.gmra.mrb[4].mxu0 %vm365_vm1, %v352_v30 }
 0x154   : > { %1115 = vmatprep.mubr.msk.f32.mxu0 %vm365_vm1, %v353_v31 }
 0x157   : > { %1116 = vmatmul.mubr.msk.f32.gmra.mrb[6].mxu0 %vm365_vm1, %v354_v32 }
 0x158   : > { %1118 = vmatprep.mubr.msk.f32.mxu0 %vm365_vm1, %v355_v33 }
 0x15b   : > { %1119 = vmatmul.mubr.msk.f32.gmra.mrb[8].mxu0 %vm365_vm1, %v356_v34 }
 0x15c   : > { %1121 = vmatprep.mubr.msk.f32.mxu0 %vm365_vm1, %v357_v35 }
 0x15f   : > { %1122 = vmatmul.mubr.msk.f32.gmra.mrb[10].mxu0 %vm365_vm1, %v358_v36 }
 0x160   : > { %1124 = vmatprep.mubr.msk.f32.mxu0 %vm365_vm1, %v359_v37 }
 0x163   : > { %1125 = vmatmul.mubr.msk.f32.gmra.mrb[12].mxu0 %vm365_vm1, %v360_v40 }
 0x164   : > { %1127 = vmatprep.mubr.msk.f32.mxu0 %vm365_vm1, %v361_v41 }
 0x167   : > { %1128 = vmatmul.mubr.msk.f32.gmra.mrb[14].mxu0 %vm365_vm1, %v362_v42 }
 0x168   : > { %1130 = vmatprep.mubr.msk.f32.mxu0 %vm365_vm1, %v363_v43 }
 0x16b   : > { %1131 = vmatmul.mubr.msk.f32.gmra.mrb[16].mxu0 %vm365_vm1, %v364_v44 }
 0x222   : > { %v1111_v46 = vpop.f32.mrb[2].mxu0 }
 0x223   : > { %v486_v47 = vadd.f32 %v1111_v46, %v996_v45  ;;  %v480_v48 = vpop.f32.mrb[3].mxu0 }
 0x224   : > { %v481_v49 = vadd.f32 %v996_v45, %v480_v48 }
 0x225   : > { %561 = vmax.xlane.f32.xlu1 %v486_v47 }
 0x226   : > { %v1114_v50 = vpop.f32.mrb[4].mxu0  ;;  %559 = vmax.xlane.f32.xlu0 %v481_v49 }
 0x227   : > { %v496_v51 = vadd.f32 %v1114_v50, %v996_v45  ;;  %v490_v52 = vpop.f32.mrb[5].mxu0 }
 0x228   : > { %v491_v54 = vadd.f32 %v996_v45, %v490_v52 }
 0x229   : > { %565 = vmax.xlane.f32.xlu1 %v496_v51 }
 0x22a   : > { %v1117_v53 = vpop.f32.mrb[6].mxu0 }
 0x22b   : > { %v500_v55 = vpop.f32.mrb[7].mxu0  ;;  %v506_v56 = vadd.f32 %v1117_v53, %v996_v45 }
 0x22c   : > { %v501_v60 = vadd.f32 %v996_v45, %v500_v55 }
 0x22d   : > { %563 = vmax.xlane.f32.xlu1 %v491_v54 }
 0x22e   : > { %v1120_v57 = vpop.f32.mrb[8].mxu0 }
 0x22f   : > { %v510_v58 = vpop.f32.mrb[9].mxu0  ;;  %v516_v62 = vadd.f32 %v1120_v57, %v996_v45 }
 0x230   : > { %v511_v3 = vadd.f32 %v996_v45, %v510_v58 }
 0x231   : > { %569 = vmax.xlane.f32.xlu1 %v506_v56 }
 0x232   : > { %v1123_v59 = vpop.f32.mrb[10].mxu0 }
 0x233   : > { %v520_v61 = vpop.f32.mrb[11].mxu0  ;;  %v1729_v5 = vadd.f32 %v1123_v59, %v996_v45 }
 0x234   : > { %v1732_v8 = vadd.f32 %v996_v45, %v520_v61 }
 0x235   : > { %567 = vmax.xlane.f32.xlu1 %v501_v60 }
 0x236   : > { %v1126_v63 = vpop.f32.mrb[12].mxu0 }
 0x237   : > { %v530_v1 = vpop.f32.mrb[13].mxu0  ;;  %v1735_v9 = vadd.f32 %v1126_v63, %v996_v45 }
 0x238   : > { %v1738_v11 = vadd.f32 %v996_v45, %v530_v1 }
 0x239   : > { %573 = vmax.xlane.f32.xlu1 %v516_v62 }
 0x23a   : > { %v1129_v2 = vpop.f32.mrb[14].mxu0 }
 0x23b   : > { %v540_v4 = vpop.f32.mrb[15].mxu0  ;;  %v1741_v12 = vadd.f32 %v1129_v2, %v996_v45 }
 0x23c   : > { %v1744_v13 = vadd.f32 %v996_v45, %v540_v4 }
 0x23d   : > { %571 = vmax.xlane.f32.xlu1 %v511_v3 }
 0x23e   : > { %v1132_v6 = vpop.f32.mrb[16].mxu0 }
 0x23f   : > { %v550_v7 = vpop.f32.mrb[17].mxu0  ;;  %v1749_v15 = vadd.f32 %v1132_v6, %v996_v45 }
 0x240   : > { %v1747_v14 = vadd.f32 %v996_v45, %v550_v7 }
 0x241   : > { %577 = vmax.xlane.f32.xlu1 %v1729_v5 }
 0x245   : > { %575 = vmax.xlane.f32.xlu1 %v1732_v8 }
 0x249   : > { %581 = vmax.xlane.f32.xlu1 %v1735_v9 }
 0x24d   : > { %579 = vmax.xlane.f32.xlu1 %v1738_v11 }
 0x251   : > { %585 = vmax.xlane.f32.xlu1 %v1741_v12 }
 0x255   : > { %583 = vmax.xlane.f32.xlu1 %v1744_v13 }
 0x259   : > { %587 = vmax.xlane.f32.xlu1 %v1747_v14 }
 0x25d   : > { %589 = vmax.xlane.f32.xlu1 %v1749_v15 }
 0x2b2   : > { %v562_v16 = vpop.xlane.xlu1 %561 }
 0x2b3   : > { %v592_v17 = vsub.f32 %v486_v47, %v562_v16  ;;  %v560_v18 = vpop.xlane.xlu0 %559 }
 0x2b4   : > { %v591_v19 = vsub.f32 %v481_v49, %v560_v18 }
 0x2b5   : > { %v609_v20 = vmul.f32 1.442695, %v592_v17 }
 0x2b6   : > { %v566_v21 = vpop.xlane.xlu1 %565  ;;  %v607_v22 = vmul.f32 1.442695, %v591_v19 }
 0x2b7   : > { %1285 = vpow2.f32 %v609_v20  ;;  %v594_v23 = vsub.f32 %v496_v51, %v566_v21 }
 0x2b8   : > { %1287 = vpow2.f32 %v607_v22 }
 0x2b9   : > { %v613_v25 = vmul.f32 1.442695, %v594_v23 }
 0x2ba   : > { %v564_v24 = vpop.xlane.xlu1 %563 }
 0x2bb   : > { %v593_v26 = vsub.f32 %v491_v54, %v564_v24  ;;  %1289 = vpow2.f32 %v613_v25 }
 0x2bd   : > { %v611_v28 = vmul.f32 1.442695, %v593_v26 }
 0x2be   : > { %v570_v27 = vpop.xlane.xlu1 %569 }
 0x2bf   : > { %v596_v29 = vsub.f32 %v506_v56, %v570_v27  ;;  %1291 = vpow2.f32 %v611_v28 }
 0x2c1   : > { %v1753_v30 = vpop.eup %1285  ;;  %v617_v32 = vmul.f32 1.442695, %v596_v29 }
 0x2c2   : > { %641 = vadd.xlane.f32.xlu1 %v1753_v30  ;;  %v568_v31 = vpop.xlane.xlu1 %567  ;;  %v1756_v34 = vpop.eup %1287 }
 0x2c3   : > { %v595_v33 = vsub.f32 %v501_v60, %v568_v31  ;;  %1293 = vpow2.f32 %v617_v32 }
 0x2c5   : > { %v615_v36 = vmul.f32 1.442695, %v595_v33  ;;  %v1759_v38 = vpop.eup %1289 }
 0x2c6   : > { %v574_v35 = vpop.xlane.xlu1 %573  ;;  %639 = vadd.xlane.f32.xlu1 %v1756_v34 }
 0x2c7   : > { %v598_v37 = vsub.f32 %v516_v62, %v574_v35  ;;  %1295 = vpow2.f32 %v615_v36 }
 0x2c9   : > { %v621_v40 = vmul.f32 1.442695, %v598_v37  ;;  %v1762_v42 = vpop.eup %1291 }
 0x2ca   : > { %v572_v39 = vpop.xlane.xlu1 %571  ;;  %645 = vadd.xlane.f32.xlu1 %v1759_v38 }
 0x2cb   : > { %v597_v41 = vsub.f32 %v511_v3, %v572_v39  ;;  %1297 = vpow2.f32 %v621_v40 }
 0x2cd   : > { %v619_v44 = vmul.f32 1.442695, %v597_v41  ;;  %v1766_v46 = vpop.eup %1293 }
 0x2ce   : > { %v578_v43 = vpop.xlane.xlu1 %577  ;;  %643 = vadd.xlane.f32.xlu1 %v1762_v42 }
 0x2cf   : > { %v600_v45 = vsub.f32 %v1729_v5, %v578_v43  ;;  %1299 = vpow2.f32 %v619_v44 }
 0x2d1   : > { %v625_v48 = vmul.f32 1.442695, %v600_v45  ;;  %v1770_v50 = vpop.eup %1295 }
 0x2d2   : > { %v576_v47 = vpop.xlane.xlu1 %575  ;;  %649 = vadd.xlane.f32.xlu1 %v1766_v46 }
 0x2d3   : > { %v599_v49 = vsub.f32 %v1732_v8, %v576_v47  ;;  %1301 = vpow2.f32 %v625_v48 }
 0x2d5   : > { %v623_v52 = vmul.f32 1.442695, %v599_v49  ;;  %v1773_v53 = vpop.eup %1297 }
 0x2d6   : > { %v582_v51 = vpop.xlane.xlu1 %581  ;;  %647 = vadd.xlane.f32.xlu1 %v1770_v50 }
 0x2d7   : > { %v602_v54 = vsub.f32 %v1735_v9, %v582_v51  ;;  %1303 = vpow2.f32 %v623_v52 }
 0x2d9   : > { %v1778_v57 = vpop.eup %1299  ;;  %v629_v59 = vmul.f32 1.442695, %v602_v54 }
 0x2da   : > { %v580_v55 = vpop.xlane.xlu1 %579  ;;  %653 = vadd.xlane.f32.xlu1 %v1773_v53 }
 0x2db   : > { %v601_v56 = vsub.f32 %v1738_v11, %v580_v55 }
 0x2dd   : > { %v627_v58 = vmul.f32 1.442695, %v601_v56  ;;  %v1782_v62 = vpop.eup %1301 }
 0x2de   : > { %v586_v60 = vpop.xlane.xlu1 %585  ;;  %651 = vadd.xlane.f32.xlu1 %v1778_v57 }
 0x2df   : > { %1305 = vpow2.f32 %v627_v58  ;;  %v604_v61 = vsub.f32 %v1741_v12, %v586_v60 }
 0x2e0   : > { %1307 = vpow2.f32 %v629_v59 }
 0x2e1   : > { %v633_v63 = vmul.f32 1.442695, %v604_v61  ;;  %v1786_v3 = vpop.eup %1303 }
 0x2e2   : > { %v584_v1 = vpop.xlane.xlu1 %583  ;;  %657 = vadd.xlane.f32.xlu1 %v1782_v62 }
 0x2e3   : > { %1309 = vpow2.f32 %v633_v63  ;;  %v603_v2 = vsub.f32 %v1744_v13, %v584_v1 }
 0x2e5   : > { %v631_v4 = vmul.f32 1.442695, %v603_v2 }
 0x2e6   : > { %v588_v5 = vpop.xlane.xlu1 %587  ;;  %655 = vadd.xlane.f32.xlu1 %v1786_v3 }
 0x2e7   : > { %1311 = vpow2.f32 %v631_v4  ;;  %v605_v6 = vsub.f32 %v1747_v14, %v588_v5 }
 0x2e9   : > { %v1790_v7 = vpop.eup %1305  ;;  %v635_v8 = vmul.f32 1.442695, %v605_v6 }
 0x2ea   : > { %v590_v9 = vpop.xlane.xlu1 %589  ;;  %659 = vadd.xlane.f32.xlu1 %v1790_v7  ;;  %v1794_v12 = vpop.eup %1307 }
 0x2eb   : > { %1313 = vpow2.f32 %v635_v8  ;;  %v606_v11 = vsub.f32 %v1749_v15, %v590_v9 }
 0x2ed   : > { %v1796_v13 = vpop.eup %1309  ;;  %v637_v16 = vmul.f32 1.442695, %v606_v11 }
 0x2ee   : > { %665 = vadd.xlane.f32.xlu0 %v1796_v13  ;;  %661 = vadd.xlane.f32.xlu1 %v1794_v12 }
 0x2ef   : > { %1315 = vpow2.f32 %v637_v16 }
 0x2f1   : > { %v1800_v14 = vpop.eup %1311 }
 0x2f2   : > { %663 = vadd.xlane.f32.xlu1 %v1800_v14 }
 0x2f5   : > { %v1803_v17 = vpop.eup %1313 }
 0x2f6   : > { %667 = vadd.xlane.f32.xlu1 %v1803_v17 }
 0x2f9   : > { %v1806_v15 = vpop.eup %1315 }
 0x2fa   : > { %669 = vadd.xlane.f32.xlu0 %v1806_v15 }
 0x34f   : > { %v642_v18 = vpop.xlane.xlu1 %641 }
 0x350   : > { %1317 = vrcp.f32 %v642_v18 }
 0x353   : > { %v640_v19 = vpop.xlane.xlu1 %639 }
 0x354   : > { %1319 = vrcp.f32 %v640_v19 }
 0x357   : > { %v646_v20 = vpop.xlane.xlu1 %645 }
 0x358   : > { %1321 = vrcp.f32 %v646_v20 }
 0x35a   : > { %v1318_v21 = vpop.eup %1317 }
 0x35b   : > { %v688_v22 = vmul.f32 %v1318_v21, %v642_v18  ;;  %v644_v23 = vpop.xlane.xlu1 %643 }
 0x35c   : > { %1323 = vrcp.f32 %v644_v23 }
 0x35d   : > { %v704_v24 = vsub.f32 2.0, %v688_v22 }
 0x35e   : > { %v1320_v25 = vpop.eup %1319 }
 0x35f   : > { %v720_v26 = vmul.f32 %v1318_v21, %v704_v24  ;;  %v687_v27 = vmul.f32 %v1320_v25, %v640_v19  ;;  %v650_v28 = vpop.xlane.xlu1 %649 }
 0x360   : > { %1325 = vrcp.f32 %v650_v28 }
 0x361   : > { %v703_v29 = vsub.f32 2.0, %v687_v27  ;;  %v736_v31 = vmul.f32 %v1753_v30, %v720_v26 }
 0x362   : > { %v1322_v32 = vpop.eup %1321 }
 0x363   : > { %v719_v33 = vmul.f32 %v1320_v25, %v703_v29  ;;  %v690_v35 = vmul.f32 %v1322_v32, %v646_v20  ;;  %v648_v36 = vpop.xlane.xlu1 %647  ;;  %752 = vst [vmem:[%s1811_s28 + $0x8] sm:$0xff] %v736_v31 }
 0x364   : > { %1327 = vrcp.f32 %v648_v36 }
 0x365   : > { %v706_v37 = vsub.f32 2.0, %v690_v35  ;;  %v735_v39 = vmul.f32 %v1756_v34, %v719_v33 }
 0x366   : > { %v1324_v40 = vpop.eup %1323 }
 0x367   : > { %v722_v41 = vmul.f32 %v1322_v32, %v706_v37  ;;  %v689_v43 = vmul.f32 %v1324_v40, %v644_v23  ;;  %v654_v44 = vpop.xlane.xlu1 %653  ;;  %751 = vst [vmem:[%s1811_s28] sm:$0xff] %v735_v39  ;;  %v1193_v30 = vpack.c.bf16 %v736_v31, %v735_v39 }
 0x368   : > { %1329 = vrcp.f32 %v654_v44 }
 0x369   : > { %v705_v45 = vsub.f32 2.0, %v689_v43  ;;  %1194 = vmatpush3.bf16.xpose.msra.mxu1 %v1193_v30  ;;  %v738_v47 = vmul.f32 %v1759_v38, %v722_v41 }
 0x36a   : > { %v1326_v48 = vpop.eup %1325  ;;  %1195 = vmatprep.subr.bf16.mxu1 %v1515_v0 }
 0x36b   : > { %v721_v49 = vmul.f32 %v1324_v40, %v705_v45  ;;  %v692_v51 = vmul.f32 %v1326_v48, %v650_v28  ;;  %v652_v52 = vpop.xlane.xlu1 %651  ;;  %754 = vst [vmem:[%s1811_s28 + $0x18] sm:$0xff] %v738_v47 }
 0x36c   : > { %1331 = vrcp.f32 %v652_v52 }
 0x36d   : > { %v708_v34 = vsub.f32 2.0, %v692_v51  ;;  %v737_v54 = vmul.f32 %v1762_v42, %v721_v49 }
 0x36e   : > { %v1328_v55 = vpop.eup %1327 }
 0x36f   : > { %v724_v56 = vmul.f32 %v1326_v48, %v708_v34  ;;  %v691_v58 = vmul.f32 %v1328_v55, %v648_v36  ;;  %v658_v59 = vpop.xlane.xlu1 %657  ;;  %753 = vst [vmem:[%s1811_s28 + $0x10] sm:$0xff] %v737_v54  ;;  %v1196_v60 = vpack.c.bf16 %v738_v47, %v737_v54 }
 0x370   : > { %1333 = vrcp.f32 %v658_v59 }
 0x371   : > { %v707_v38 = vsub.f32 2.0, %v691_v58  ;;  %1197 = vmatpush3.bf16.xpose.msra.mxu1 %v1196_v60  ;;  %v740_v61 = vmul.f32 %v1766_v46, %v724_v56 }
 0x372   : > { %v1330_v63 = vpop.eup %1329  ;;  %1198 = vmatprep.subr.bf16.mxu1 %v1515_v0 }
 0x373   : > { %v723_v1 = vmul.f32 %v1328_v55, %v707_v38  ;;  %v694_v2 = vmul.f32 %v1330_v63, %v654_v44  ;;  %v656_v4 = vpop.xlane.xlu1 %655  ;;  %756 = vst [vmem:[%s1811_s28 + $0x28] sm:$0xff] %v740_v61 }
 0x374   : > { %1335 = vrcp.f32 %v656_v4 }
 0x375   : > { %v710_v42 = vsub.f32 2.0, %v694_v2  ;;  %v739_v5 = vmul.f32 %v1770_v50, %v723_v1 }
 0x376   : > { %v1332_v6 = vpop.eup %1331 }
 0x377   : > { %v726_v8 = vmul.f32 %v1330_v63, %v710_v42  ;;  %v693_v9 = vmul.f32 %v1332_v6, %v652_v52  ;;  %v660_v11 = vpop.xlane.xlu1 %659  ;;  %755 = vst [vmem:[%s1811_s28 + $0x20] sm:$0xff] %v739_v5  ;;  %v1199_v16 = vpack.c.bf16 %v740_v61, %v739_v5 }
 0x378   : > { %1337 = vrcp.f32 %v660_v11 }
 0x379   : > { %v709_v46 = vsub.f32 2.0, %v693_v9  ;;  %1200 = vmatpush3.bf16.xpose.msra.mxu1 %v1199_v16  ;;  %v742_v18 = vmul.f32 %v1773_v53, %v726_v8 }
 0x37a   : > { %v1334_v19 = vpop.eup %1333  ;;  %1201 = vmatprep.subr.bf16.mxu1 %v1515_v0 }
 0x37b   : > { %v725_v20 = vmul.f32 %v1332_v6, %v709_v46  ;;  %v696_v21 = vmul.f32 %v1334_v19, %v658_v59  ;;  %v662_v22 = vpop.xlane.xlu1 %661  ;;  %v666_v50 = vpop.xlane.xlu0 %665  ;;  %758 = vst [vmem:[%s1811_s28 + $0x38] sm:$0xff] %v742_v18 }
 0x37c   : > { %1339 = vrcp.f32 %v662_v22 }
 0x37d   : > { %v712_v23 = vsub.f32 2.0, %v696_v21  ;;  %1341 = vrcp.f32 %v666_v50  ;;  %v741_v24 = vmul.f32 %v1778_v57, %v725_v20 }
 0x37e   : > { %v1336_v25 = vpop.eup %1335 }
 0x37f   : > { %v728_v26 = vmul.f32 %v1334_v19, %v712_v23  ;;  %v695_v27 = vmul.f32 %v1336_v25, %v656_v4  ;;  %v664_v28 = vpop.xlane.xlu1 %663  ;;  %757 = vst [vmem:[%s1811_s28 + $0x30] sm:$0xff] %v741_v24  ;;  %v1202_v53 = vpack.c.bf16 %v742_v18, %v741_v24 }
 0x380   : > { %1343 = vrcp.f32 %v664_v28 }
 0x381   : > { %v711_v29 = vsub.f32 2.0, %v695_v27  ;;  %1203 = vmatpush3.bf16.xpose.msra.mxu1 %v1202_v53  ;;  %v744_v31 = vmul.f32 %v1782_v62, %v728_v26 }
 0x382   : > { %v1338_v32 = vpop.eup %1337  ;;  %1204 = vmatprep.subr.bf16.mxu1 %v1515_v0 }
 0x383   : > { %v727_v33 = vmul.f32 %v1336_v25, %v711_v29  ;;  %v697_v35 = vmul.f32 %v1338_v32, %v660_v11  ;;  %v668_v36 = vpop.xlane.xlu1 %667  ;;  %760 = vst [vmem:[%s1811_s28 + $0x48] sm:$0xff] %v744_v31 }
 0x384   : > { %1345 = vrcp.f32 %v668_v36 }
 0x385   : > { %v713_v57 = vsub.f32 2.0, %v697_v35  ;;  %v743_v37 = vmul.f32 %v1786_v3, %v727_v33 }
 0x386   : > { %v1340_v39 = vpop.eup %1339 }
 0x387   : > { %v1342_v40 = vpop.eup %1341  ;;  %v729_v41 = vmul.f32 %v1338_v32, %v713_v57  ;;  %v698_v43 = vmul.f32 %v1340_v39, %v662_v22  ;;  %v670_v44 = vpop.xlane.xlu0 %669  ;;  %759 = vst [vmem:[%s1811_s28 + $0x40] sm:$0xff] %v743_v37  ;;  %v1205_v30 = vpack.c.bf16 %v744_v31, %v743_v37 }
 0x388   : > { %v700_v62 = vmul.f32 %v1342_v40, %v666_v50  ;;  %1347 = vrcp.f32 %v670_v44 }
 0x389   : > { %v714_v45 = vsub.f32 2.0, %v698_v43  ;;  %1206 = vmatpush3.bf16.xpose.msra.mxu1 %v1205_v30  ;;  %v745_v47 = vmul.f32 %v1790_v7, %v729_v41 }
 0x38a   : > { %v1344_v48 = vpop.eup %1343  ;;  %v716_v49 = vsub.f32 2.0, %v700_v62  ;;  %1207 = vmatprep.subr.bf16.mxu1 %v1515_v0 }
 0x38b   : > { %v730_v3 = vmul.f32 %v1340_v39, %v714_v45  ;;  %v699_v51 = vmul.f32 %v1344_v48, %v664_v28  ;;  %761 = vst [vmem:[%s1811_s28 + $0x50] sm:$0xff] %v745_v47 }
 0x38c   : > { %v732_v52 = vmul.f32 %v1342_v40, %v716_v49 }
 0x38d   : > { %v715_v34 = vsub.f32 2.0, %v699_v51  ;;  %v746_v54 = vmul.f32 %v1794_v12, %v730_v3 }
 0x38e   : > { %v1346_v55 = vpop.eup %1345  ;;  %v748_v56 = vmul.f32 %v1796_v13, %v732_v52 }
 0x38f   : > { %v731_v58 = vmul.f32 %v1344_v48, %v715_v34  ;;  %v701_v59 = vmul.f32 %v1346_v55, %v668_v36  ;;  %762 = vst [vmem:[%s1811_s28 + $0x58] sm:$0xff] %v746_v54  ;;  %v1208_v7 = vpack.c.bf16 %v746_v54, %v745_v47 }
 0x390   : > { %764 = vst [vmem:[%s1811_s28 + $0x68] sm:$0xff] %v748_v56 }
 0x391   : > { %v717_v60 = vsub.f32 2.0, %v701_v59  ;;  %1209 = vmatpush3.bf16.xpose.msra.mxu1 %v1208_v7  ;;  %v747_v38 = vmul.f32 %v1800_v14, %v731_v58 }
 0x392   : > { %v1348_v61 = vpop.eup %1347  ;;  %1210 = vmatprep.subr.bf16.mxu1 %v1515_v0 }
 0x393   : > { %v733_v63 = vmul.f32 %v1346_v55, %v717_v60  ;;  %v702_v12 = vmul.f32 %v1348_v61, %v670_v44  ;;  %763 = vst [vmem:[%s1811_s28 + $0x60] sm:$0xff] %v747_v38  ;;  %v1211_v4 = vpack.c.bf16 %v748_v56, %v747_v38 }
 0x395   : > { %v749_v13 = vmul.f32 %v1803_v17, %v733_v63  ;;  %v718_v1 = vsub.f32 2.0, %v702_v12 }
 0x397   : > { %765 = vst [vmem:[%s1811_s28 + $0x70] sm:$0xff] %v749_v13  ;;  %v734_v2 = vmul.f32 %v1348_v61, %v718_v1 }
 0x399   : > { %v750_v42 = vmul.f32 %v1806_v15, %v734_v2  ;;  %1212 = vmatpush3.bf16.xpose.msra.mxu1 %v1211_v4 }
 0x39a   : > { %1213 = vmatprep.subr.bf16.mxu1 %v1515_v0 }
 0x39b   : > { %766 = vst [vmem:[%s1811_s28 + $0x78] sm:$0xff] %v750_v42  ;;  %v1214_v14 = vpack.c.bf16 %v750_v42, %v749_v13 }
 0x3a1   : > { %1215 = vmatpush3.bf16.xpose.msra.mxu1 %v1214_v14 }
 0x3a8   : > { %1166 = vmatmul.mubr.f32.vlgmr.msra.gmra.mrb[0].mxu1 %v1700_v10 }
 0x3a9   : > { %1420 = shalt.err (!%p1417_p7)
}
 0x3aa   : > { %s1421_s13 = scalar_lea.hbm %s1857_s6, 2048  ;;  %s1425_s9 = scalar_lea.hbm %s1939_s4, 4096 }
 0x3ab   : > { %p1422_p9 = scmp.ne.s32.totalorder %s1857_s6, %s1421_s13  ;;  %p1426_p0 = scmp.lt.u32.totalorder %s1857_s6, %s1939_s4 }
 0x3ac   : > { %p1427_p11 = scmp.lt.u32.totalorder %s1425_s9, %s1421_s13  ;;  %p1429_p4 = scmp.lt.u32.totalorder %s1421_s13, %s1857_s6 }
 0x3ad   : > { %p1423_p2 = pnand %p1422_p9, %p1638_p12 }
 0x3ae   : > { %p1428_p1 = por %p1427_p11, %p1426_p0 }
 0x3af   : > { %p1424_p5 = pneg %p1423_p2 }
 0x3b0   : > { %p1430_p6 = por %p1429_p4, %p1428_p1 }
 0x3b2   : > { %p1431_p8 = pnand %p1430_p6, %p1424_p5 }
 0x3b4   : > { %1434 = shalt.err (!%p1431_p8)
}
 0x3b5   : > { %s1519_s14 = smov 128   ;;  %s1520_s20 = smov 8  }
 0x3b6   : > { %1223 = dma.vmem_to_hbm [thread:$0]  (%p1638_p12), %s1859_s10, 2048, %s1857_s6, %s844_s5, %s1519_s14, %s1519_s14, %s1520_s20  }
 0x3b7   : > { %s231_s7 = scalar_lea.vmem [#allocation7], %s992_s11  ;;  %s1015_s8 = sshll.u32 %s1568_s19, 7 }
 0x3b8   : > { %s857_s26 = sshll.u32 %s231_s7, 4  ;;  %s1893_s21 = scalar_lea.hbm %s1938_s3, %s1015_s8  ;;  %s1888_s26 = int_to_ptr.vmem [resolvable:$true] %s857_s26 }
 0x3b9   : > { %s839_s23 = scalar_lea.sflag [#allocation4], %s1683_s25  ;;  %s1435_s9 = scalar_lea.vmem %s1888_s26, 128 }
 0x3ba   : > { %p1436_p10 = scmp.ne.s32.totalorder %s1888_s26, %s1435_s9  ;;  %s1521_s19 = smov [#allocation7]  }
 0x3bb   : > { %s1439_s11 = sshll.u32 %s1521_s19, 4  ;;  %s1440_s11 = int_to_ptr.vmem [resolvable:$false] %s1439_s11 }
 0x3bc   : > { %p1437_p13 = pnand %p1436_p10, %p1638_p12  ;;  %s1441_s10 = scalar_lea.vmem %s1440_s11, 256 }
 0x3bd   : > { %p1442_p7 = scmp.lt.s32.totalorder %s1888_s26, %s1440_s11  ;;  %p1443_p9 = scmp.lt.s32.totalorder %s1441_s10, %s1435_s9 }
 0x3be   : > { %p1438_p3 = pneg %p1437_p13 }
 0x3bf   : > { %p1444_p2 = por %p1443_p9, %p1442_p7 }
 0x3c1   : > { %p1445_p5 = pnand %p1444_p2, %p1438_p3 }
 0x47b   : > { %v833_v0 = vpop.f32.mrb[0].mxu1 }
 0x47c   : > { %837 = vst [vmem:[%s231_s7] sm:$0xff] %v833_v0  ;;  %v1167_v10 = vpop.f32.mrb[1].mxu1 }
 0x47d   : > { %1448 = shalt.err (!%p1445_p5)
}
 0x47e   : > { %s1449_s25 = scalar_lea.hbm %s1893_s21, 128  ;;  %s1453_s28 = scalar_lea.hbm %s1938_s3, 256 }
 0x47f   : > { %p1450_p0 = scmp.ne.s32.totalorder %s1893_s21, %s1449_s25  ;;  %p1454_p4 = scmp.lt.u32.totalorder %s1893_s21, %s1938_s3 }
 0x480   : > { %p1455_p6 = scmp.lt.u32.totalorder %s1453_s28, %s1449_s25  ;;  %p1457_p10 = scmp.lt.u32.totalorder %s1449_s25, %s1893_s21 }
 0x481   : > { %p1451_p11 = pnand %p1450_p0, %p1638_p12 }
 0x482   : > { %p1456_p8 = por %p1455_p6, %p1454_p4 }
 0x483   : > { %p1452_p1 = pneg %p1451_p11 }
 0x484   : > { %p1458_p13 = por %p1457_p10, %p1456_p8 }
 0x486   : > { %p1459_p3 = pnand %p1458_p13, %p1452_p1 }
 0x488   : > { %1462 = shalt.err (!%p1459_p3)
}
 0x489   : > { %1222 = dma.vmem_to_hbm [thread:$0]  (%p1638_p12), %s1888_s26, 128, %s1893_s21, %s839_s23  }
 0x48a PF: > { %s885_s20 = sand.u32 1, %s1497_s15   ;;  %p1954_p7 = scmp.ne.s32.totalorder %s1944_s22, 0 }
 0x48b   : > { %p1955_p9 = scmp.ge.s32.totalorder %s1509_s18, 2  ;;  %s886_s7 = scalar_lea.sflag [#allocation4], %s885_s20 }
 0x48d   : > { %p1235_p2 = pnand %p1955_p9, %p1954_p7 }
 0x48f   : > { %1488 = dma.done.wait (!%p1235_p2), %s886_s7, 128  }
 0x490   : > { %1490 = vsyncadd (!%p1235_p2), %s886_s7, 4294967168  ;;  %s895_s8 = scalar_lea.sflag [#allocation9], %s885_s20 }
 0x491   : > { %1492 = dma.done.wait (!%p1235_p2), %s895_s8, 2048  }
 0x492   : > { %1494 = vsyncadd (!%p1235_p2), %s895_s8, 4294965248  ;;  %p22_p12 = scmp.ge.s32.totalorder %s1603_s27, 4   ;;  %s1956_s15 = smov %s1501_s16 }
 0x493   : > { %s1957_s16 = smov %s1505_s17  ;;  %s1958_s17 = smov %s1634_s24 }
 0x494   : > { %s1959_s18 = smov %s1603_s27  ;;  %24 = sbr.rel (!%p22_p12) target bundleno = 8 (0x8), region = 98 }
 0x49b   :  { %900 = vsyncpa [#allocation3], 1 }
 0x49c   :  { %902 = vsyncpa [#allocation3 + $0x1], 1 }
 0x49d   :  { %903 = vsyncpa [#allocation6], 1 }
 0x49e   :  { %904 = vsyncpa [#allocation4], 1 }
 0x49f   :  { %906 = vsyncpa [#allocation4 + $0x1], 1 }
 0x4a0   :  { %907 = vsyncpa [#allocation9], 1 }
 0x4a1   :  { %909 = vsyncpa [#allocation9 + $0x1], 1 }

// kernel: tpu_custom_call.1
= control target key start
LH: loop header
LB: loop body
LE: loop exit
PB: predicated region body
PF: predicated region fallthrough
CT: control target
= control target key end

     0   :  { %10 = vsyncpa [#allocation3], 0  ;;  %s1935_s0 = inlined_call_operand.hbm [shape: f32[2,8,128], index: 0, kind: input, shape index: {}]   ;;  %s1936_s1 = inlined_call_operand.hbm [shape: f32[128,128], index: 1, kind: input, shape index: {}]   ;;  %s1937_s2 = inlined_call_operand.vmem [shape: f32[1,128], index: 2, kind: input, shape index: {}]   ;;  %s1938_s3 = inlined_call_operand.hbm [shape: f32[2,8,128], index: 3, kind: output, shape index: {0}]   ;;  %s1939_s4 = inlined_call_operand.hbm [shape: f32[2,128,128], index: 4, kind: output, shape index: {1}]  }
   0x1   :  { %12 = vsyncpa [#allocation3 + $0x1], 0 }
   0x2   :  { %13 = vsyncpa [#allocation6], 0 }
   0x3   :  { %14 = vsyncpa [#allocation4], 0 }
   0x4   :  { %16 = vsyncpa [#allocation4 + $0x1], 0 }
   0x5   :  { %17 = vsyncpa [#allocation9], 0 }
   0x6   :  { %19 = vsyncpa [#allocation9 + $0x1], 0  ;;  %s1547_s15 = smov 0   ;;  %s1549_s16 = smov 0  }
   0x7   :  { %s1551_s17 = smov 0   ;;  %s1553_s18 = smov 0  }
   0x8 LB: > { %s1568_s19 = sadd.s32 4294967295, %s1509_s18   ;;  %s985_s20 = sadd.s32 4294967294, %s1509_s18   ;;  %s1509_s18 = sphi %s1553_s18, %s1959_s18   ;;  %s1505_s17 = sphi %s1551_s17, %s1958_s17   ;;  %s1501_s16 = sphi %s1549_s16, %s1957_s16   ;;  %s1497_s15 = sphi %s1547_s15, %s1956_s15  }
   0x9   : > { %p45_p0 = scmp.ne.s32.totalorder %s1501_s16, %s1497_s15  ;;  %p1940_p1 = scmp.eq.s32.totalorder %s1568_s19, 0 }
   0xa   : > { %p117_p3 = scmp.eq.s32.totalorder %s985_s20, 1  ;;  %p986_p5 = scmp.ge.s32.totalorder %s1509_s18, 1 }
   0xb   : > { %p1577_p4 = por %p1940_p1, %p45_p0  ;;  %p150_p7 = scmp.lt.s32.totalorder %s1509_s18, 3 }
   0xc   : > { %p1582_p6 = por %p117_p3, %p45_p0  ;;  %s1511_s24 = smov [#allocation5]  }
   0xd   : > { %s1943_s21 = scalar_select %p1577_p4, 1, 0 }
   0xe   : > { %s1944_s22 = scalar_select %p1582_p6, 1, 0 }
   0xf   : > { %p1587_p8 = pnand %p986_p5, %p150_p7  ;;  %s162_s25 = sshll.u32 %s1511_s24, 4  ;;  %s1591_s25 = int_to_ptr.vmem [resolvable:$true] %s162_s25 }
  0x10   : > { %s1603_s27 = sadd.s32 1, %s1509_s18   ;;  %s32_s28 = sadd.s32 1, %s1505_s17 }
  0x11   : > { %s1945_s23 = scalar_select %p1587_p8, 1, 0 }
  0x12   : > { %p1226_p9 = pneg %p1587_p8  ;;  %s29_s29 = ssub.s32 %s1509_s18, %s1603_s27 }
  0x13   : > { %s1349_s6 = scalar_lea.hbm %s1936_s1, 2048 }
  0x14   : > { %p1598_p11 = pnand %p1226_p9, %p1940_p1  ;;  %p1350_p12 = scmp.ne.s32.totalorder %s1936_s1, %s1349_s6 }
  0x15   : > { %p1356_p5 = scmp.lt.u32.totalorder %s1349_s6, %s1936_s1 }
  0x16   : > { %p1351_p13 = pneg %p1598_p11 }
  0x18   : > { %p1352_p0 = pnand %p1351_p13, %p1350_p12 }
  0x1a   : > { %p1353_p3 = pneg %p1352_p0 }
  0x1c   : > { %p1358_p7 = pnand %p1356_p5, %p1353_p3 }
  0x1e   : > { %1361 = shalt.err (!%p1358_p7)
}
  0x1f   : > { %s1362_s11 = scalar_lea.vmem %s1591_s25, 2048  ;;  %p1370_p2 = scmp.lt.s32.totalorder %s1591_s25, %s1591_s25 }
  0x20   : > { %p1363_p9 = scmp.ne.s32.totalorder %s1591_s25, %s1362_s11  ;;  %p1371_p6 = scmp.lt.s32.totalorder %s1362_s11, %s1362_s11 }
  0x22   : > { %p1365_p10 = pnand %p1363_p9, %p1351_p13  ;;  %p1372_p4 = por %p1371_p6, %p1370_p2 }
  0x24   : > { %p1366_p1 = pneg %p1365_p10 }
  0x26   : > { %p1373_p8 = pnand %p1372_p4, %p1366_p1 }
  0x28   : > { %1376 = shalt.err (!%p1373_p8)
}
  0x29   : > { %s1512_s12 = smov 128   ;;  %s1513_s13 = smov 8  }
  0x2a   : > { %1229 = dma.hbm_to_vmem [thread:$0]  (!%p1598_p11), %s1936_s1, 2048, %s1591_s25, [#allocation6], %s1512_s12, %s1512_s12, %s1513_s13  }
  0x2b   : > { %p30_p2 = scmp.eq.s32.totalorder %s29_s29, 0  ;;  %p39_p1 = scmp.ne.s32.totalorder %s1505_s17, %s1501_s16 }
  0x2c   : > { %p40_p4 = scmp.eq.s32.totalorder %s1509_s18, 0  ;;  %p1242_p6 = scmp.lt.s32.totalorder %s1509_s18, 2 }
  0x2d   : > { %s1634_s24 = scalar_select %p30_p2, %s1505_s17, %s32_s28  }
  0x2e   : > { %p41_p8 = por %p40_p4, %p39_p1  ;;  %p1947_p10 = scmp.eq.s32.totalorder %s1568_s19, 1 }
  0x2f   : > { %s179_s5 = sand.u32 1, %s1505_s17   ;;  %s990_s6 = sshll.u32 %s1509_s18, 7 }
  0x30   : > { %p1638_p12 = por %p1947_p10, %p39_p1  ;;  %s989_s7 = sshll.u32 %s179_s5, 3 }
  0x31   : > { %s1647_s9 = scalar_lea.hbm %s1935_s0, %s990_s6  ;;  %s183_s25 = scalar_lea.vmem [#allocation2], %s989_s7 }
  0x32   : > { %s190_s28 = sshll.u32 %s183_s25, 4  ;;  %p1649_p11 = pnand %p1242_p6, %p41_p8  ;;  %s1653_s28 = int_to_ptr.vmem [resolvable:$true] %s190_s28 }
  0x33   : > { %s180_s10 = scalar_lea.sflag [#allocation3], %s179_s5  ;;  %s1377_s11 = scalar_lea.hbm %s1647_s9, 128 }
  0x34   : > { %p1378_p13 = scmp.ne.s32.totalorder %s1647_s9, %s1377_s11  ;;  %p1379_p0 = pneg %p1649_p11 }
  0x35   : > { %s1382_s14 = scalar_lea.hbm %s1935_s0, 256  ;;  %p1383_p7 = scmp.lt.u32.totalorder %s1647_s9, %s1935_s0 }
  0x36   : > { %p1380_p3 = pnand %p1379_p0, %p1378_p13  ;;  %p1384_p9 = scmp.lt.u32.totalorder %s1382_s14, %s1377_s11 }
  0x37   : > { %p1386_p1 = scmp.lt.u32.totalorder %s1377_s11, %s1647_s9 }
  0x38   : > { %p1381_p5 = pneg %p1380_p3  ;;  %p1385_p2 = por %p1384_p9, %p1383_p7 }
  0x3a   : > { %p1387_p4 = por %p1386_p1, %p1385_p2 }
  0x3c   : > { %p1388_p6 = pnand %p1387_p4, %p1381_p5 }
  0x3e   : > { %1391 = shalt.err (!%p1388_p6)
}
  0x3f   : > { %s1392_s5 = scalar_lea.vmem %s1653_s28, 128  ;;  %s1514_s7 = smov [#allocation2]  }
  0x40   : > { %p1393_p8 = scmp.ne.s32.totalorder %s1653_s28, %s1392_s5  ;;  %s1397_s26 = sshll.u32 %s1514_s7, 4  ;;  %s1398_s26 = int_to_ptr.vmem [resolvable:$false] %s1397_s26 }
  0x41   : > { %s1399_s8 = scalar_lea.vmem %s1398_s26, 256  ;;  %p1400_p3 = scmp.lt.s32.totalorder %s1653_s28, %s1398_s26 }
  0x42   : > { %p1395_p10 = pnand %p1393_p8, %p1379_p0  ;;  %p1401_p7 = scmp.lt.s32.totalorder %s1399_s8, %s1392_s5 }
  0x44   : > { %p1396_p13 = pneg %p1395_p10  ;;  %p1402_p9 = por %p1401_p7, %p1400_p3 }
  0x46   : > { %p1403_p2 = pnand %p1402_p9, %p1396_p13 }
  0x48   : > { %1406 = shalt.err (!%p1403_p2)
}
  0x49   : > { %1233 = dma.hbm_to_vmem [thread:$0]  (!%p1649_p11), %s1647_s9, 128, %s1653_s28, %s180_s10  }
  0x4a   : > { %p1950_p5 = scmp.ne.s32.totalorder %s1945_s23, 0 }
  0x4b   : > { %s1683_s25 = sand.u32 (!%p1950_p5), 1, %s1501_s16   ;;  %p1951_p0 = scmp.ne.s32.totalorder (!%p1950_p5), %s1943_s21, 0 }
  0x4c   : > { %199 = sbr.rel (%p1950_p5) target bundleno = 1162 (0x48a), region = 32  ;;  %s992_s11 = sshll.u32 (!%p1950_p5), %s1683_s25, 3 }
  0x4d   : > { %s202_s12 = scalar_lea.sflag (!%p1950_p5), [#allocation3], %s1683_s25  ;;  %s205_s13 = scalar_lea.vmem (!%p1950_p5), [#allocation2], %s992_s11 }
  0x53   : > { %1480 = dma.done.wait (%p1951_p0), %s202_s12, 128  }
  0x54   : > { %1482 = vsyncadd (%p1951_p0), %s202_s12, 4294967168  ;;  %p1952_p11 = scmp.eq.s32.totalorder %s1568_s19, 0 }
  0x56   : > { %1484 = dma.done.wait (%p1952_p11), [#allocation6], 2048   ;;  %p1953_p1 = pmov %p1952_p11 }
  0x57   : > { %v1515_v0 = vmov 0.0|0.0   ;;  %vm1516_vm0 = vmmov 0   ;;  %v1517_v1 = vmov 0.0   ;;  %v240_v2 = vld [vmem:[#allocation5] sm:$0xff]  ;;  %v241_v3 = vld [vmem:[#allocation5 + $0x8] sm:$0xff]  ;;  %v242_v4 = vld [vmem:[#allocation5 + $0x10] sm:$0xff] }
  0x58   : > { %1486 = vsyncadd (%p1953_p1), [#allocation6], 4294965248  ;;  %1168 = vmatprep.subr.bf16.mxu0 %v1515_v0  ;;  %1104 = vmatprep.mubr.msk.f32.mxu0 %vm1516_vm0, %v1517_v1  ;;  %v1169_v5 = vpack.c.bf16 %v241_v3, %v240_v2  ;;  %v243_v6 = vld [vmem:[#allocation5 + $0x18] sm:$0xff]  ;;  %v244_v8 = vld [vmem:[#allocation5 + $0x20] sm:$0xff]  ;;  %vm365_vm1 = vcmask 64512   ;;  %s995_s9 = sshll.u32 %s1683_s25, 7 }
  0x59   : > { %1192 = vmatprep.subr.bf16.mxu1 %v1515_v0  ;;  %1165 = vmatprep.mubr.msk.f32.mxu1 %vm1516_vm0, %v1517_v1  ;;  %v1172_v7 = vpack.c.bf16 %v243_v6, %v242_v4  ;;  %v245_v9 = vld [vmem:[#allocation5 + $0x28] sm:$0xff]  ;;  %v1700_v10 = vld [vmem:[%s205_s13] sm:$0xff]  ;;  %v248_v15 = vld [vmem:[#allocation5 + $0x40] sm:$0xff]  ;;  %s1811_s28 = scalar_lea.vmem [#allocation8], %s995_s9  ;;  %s1020_s29 = sshll.u32 %s1568_s19, 11 }
  0x5a   : > { %1170 = vmatpush3.bf16.msra.mxu0 %v1169_v5  ;;  %333 = vxpose.xlu0.b32.start.end [1/1] (short) %v1700_v10, 128  ;;  %v1175_v11 = vpack.c.bf16 %v245_v9, %v244_v8  ;;  %v246_v12 = vld [vmem:[#allocation5 + $0x30] sm:$0xff]  ;;  %v247_v13 = vld [vmem:[#allocation5 + $0x38] sm:$0xff]  ;;  %v249_v16 = vld [vmem:[#allocation5 + $0x48] sm:$0xff]  ;;  %s870_s10 = sshll.u32 %s1811_s28, 4  ;;  %s1857_s6 = scalar_lea.hbm %s1939_s4, %s1020_s29  ;;  %s1859_s10 = int_to_ptr.vmem [resolvable:$true] %s870_s10 }
  0x5b   : > { %1171 = vmatprep.subr.bf16.mxu0 %v1515_v0  ;;  %v1178_v14 = vpack.c.bf16 %v247_v13, %v246_v12  ;;  %v1181_v17 = vpack.c.bf16 %v249_v16, %v248_v15  ;;  %v250_v18 = vld [vmem:[#allocation5 + $0x50] sm:$0xff]  ;;  %v251_v19 = vld [vmem:[#allocation5 + $0x58] sm:$0xff]  ;;  %v252_v21 = vld [vmem:[#allocation5 + $0x60] sm:$0xff]  ;;  %s844_s5 = scalar_lea.sflag [#allocation9], %s1683_s25  ;;  %s1407_s7 = scalar_lea.vmem %s1859_s10, 2048 }
  0x5c   : > { %v1184_v20 = vpack.c.bf16 %v251_v19, %v250_v18  ;;  %v253_v22 = vld [vmem:[#allocation5 + $0x68] sm:$0xff]  ;;  %v254_v24 = vld [vmem:[#allocation5 + $0x70] sm:$0xff]  ;;  %v255_v25 = vld [vmem:[#allocation5 + $0x78] sm:$0xff]  ;;  %p1408_p4 = scmp.ne.s32.totalorder %s1859_s10, %s1407_s7  ;;  %s1518_s26 = smov [#allocation8]  }
  0x5d   : > { %v1187_v23 = vpack.c.bf16 %v253_v22, %v252_v21  ;;  %v1190_v26 = vpack.c.bf16 %v255_v25, %v254_v24  ;;  %v996_v45 = vld [vmem:[%s1937_s2] ss:$0 sm:$0xff]  ;;  %s1411_s8 = sshll.u32 %s1518_s26, 4  ;;  %s1412_s8 = int_to_ptr.vmem [resolvable:$false] %s1411_s8 }
  0x5e   : > { %1173 = vmatpush3.bf16.msra.mxu0 %v1172_v7  ;;  %p1409_p6 = pnand %p1408_p4, %p1638_p12  ;;  %s1413_s12 = scalar_lea.vmem %s1412_s8, 4096 }
  0x5f   : > { %1174 = vmatprep.subr.bf16.mxu0 %v1515_v0  ;;  %p1414_p10 = scmp.lt.s32.totalorder %s1859_s10, %s1412_s8  ;;  %p1415_p13 = scmp.lt.s32.totalorder %s1413_s12, %s1407_s7 }
  0x60   : > { %p1410_p8 = pneg %p1409_p6 }
  0x61   : > { %p1416_p3 = por %p1415_p13, %p1414_p10 }
  0x62   : > { %1176 = vmatpush3.bf16.msra.mxu0 %v1175_v11 }
  0x63   : > { %1177 = vmatprep.subr.bf16.mxu0 %v1515_v0  ;;  %p1417_p7 = pnand %p1416_p3, %p1410_p8 }
  0x66   : > { %1179 = vmatpush3.bf16.msra.mxu0 %v1178_v14 }
  0x67   : > { %1180 = vmatprep.subr.bf16.mxu0 %v1515_v0 }
  0x6a   : > { %1182 = vmatpush3.bf16.msra.mxu0 %v1181_v17 }
  0x6b   : > { %1183 = vmatprep.subr.bf16.mxu0 %v1515_v0 }
  0x6e   : > { %1185 = vmatpush3.bf16.msra.mxu0 %v1184_v20 }
  0x6f   : > { %1186 = vmatprep.subr.bf16.mxu0 %v1515_v0 }
  0x72   : > { %1188 = vmatpush3.bf16.msra.mxu0 %v1187_v23 }
  0x73   : > { %1189 = vmatprep.subr.bf16.mxu0 %v1515_v0 }
  0x76   : > { %1191 = vmatpush3.bf16.msra.mxu0 %v1190_v26 }
  0x79   : > { %1105 = vmatmul.mubr.f32.vlgmr.msra.gmra.mrb[0].mxu0 %v1700_v10 }
  0xda   : > { %v349_v27 = vpop.trf.xlu0 }
  0xdb   : > { %1109 = vmatprep.mubr.msk.f32.mxu0 %vm365_vm1, %v349_v27 }
  0xde   : > { %v350_v28 = vpop.trf.xlu0 }
  0xe2   : > { %v351_v29 = vpop.trf.xlu0 }
  0xe6   : > { %v352_v30 = vpop.trf.xlu0 }
  0xea   : > { %v353_v31 = vpop.trf.xlu0 }
  0xee   : > { %v354_v32 = vpop.trf.xlu0 }
  0xf2   : > { %v355_v33 = vpop.trf.xlu0 }
  0xf6   : > { %v356_v34 = vpop.trf.xlu0 }
  0xfa   : > { %v357_v35 = vpop.trf.xlu0 }
  0xfe   : > { %v358_v36 = vpop.trf.xlu0 }
 0x102   : > { %v359_v37 = vpop.trf.xlu0 }
 0x106   : > { %v360_v40 = vpop.trf.xlu0 }
 0x10a   : > { %v361_v41 = vpop.trf.xlu0 }
 0x10e   : > { %v362_v42 = vpop.trf.xlu0 }
 0x112   : > { %v363_v43 = vpop.trf.xlu0 }
 0x116   : > { %v364_v44 = vpop.trf.xlu0 }
 0x14c   : > { %v323_v38 = vpop.f32.mrb[0].mxu0 }
 0x14d   : > { %v1106_v39 = vpop.f32.mrb[1].mxu0  ;;  %1107 = vmatprep.subr.mxu0 %v323_v38 }
 0x14e   : > { %1108 = vmatpush3.msra.mxu0 %v323_v38 }
 0x14f   : > { %1110 = vmatmul.mubr.msk.f32.vlgmr.msra.gmra.mrb[2].mxu0 %vm365_vm1, %v350_v28 }
 0x150   : > { %1112 = vmatprep.mubr.msk.f32.mxu0 %vm365_vm1, %v351_v29 }
 0x153   : > { %1113 = vmatmul.mubr.msk.f32.gmra.mrb[4].mxu0 %vm365_vm1, %v352_v30 }
 0x154   : > { %1115 = vmatprep.mubr.msk.f32.mxu0 %vm365_vm1, %v353_v31 }
 0x157   : > { %1116 = vmatmul.mubr.msk.f32.gmra.mrb[6].mxu0 %vm365_vm1, %v354_v32 }
 0x158   : > { %1118 = vmatprep.mubr.msk.f32.mxu0 %vm365_vm1, %v355_v33 }
 0x15b   : > { %1119 = vmatmul.mubr.msk.f32.gmra.mrb[8].mxu0 %vm365_vm1, %v356_v34 }
 0x15c   : > { %1121 = vmatprep.mubr.msk.f32.mxu0 %vm365_vm1, %v357_v35 }
 0x15f   : > { %1122 = vmatmul.mubr.msk.f32.gmra.mrb[10].mxu0 %vm365_vm1, %v358_v36 }
 0x160   : > { %1124 = vmatprep.mubr.msk.f32.mxu0 %vm365_vm1, %v359_v37 }
 0x163   : > { %1125 = vmatmul.mubr.msk.f32.gmra.mrb[12].mxu0 %vm365_vm1, %v360_v40 }
 0x164   : > { %1127 = vmatprep.mubr.msk.f32.mxu0 %vm365_vm1, %v361_v41 }
 0x167   : > { %1128 = vmatmul.mubr.msk.f32.gmra.mrb[14].mxu0 %vm365_vm1, %v362_v42 }
 0x168   : > { %1130 = vmatprep.mubr.msk.f32.mxu0 %vm365_vm1, %v363_v43 }
 0x16b   : > { %1131 = vmatmul.mubr.msk.f32.gmra.mrb[16].mxu0 %vm365_vm1, %v364_v44 }
 0x222   : > { %v1111_v46 = vpop.f32.mrb[2].mxu0 }
 0x223   : > { %v486_v47 = vadd.f32 %v1111_v46, %v996_v45  ;;  %v480_v48 = vpop.f32.mrb[3].mxu0 }
 0x224   : > { %v481_v49 = vadd.f32 %v996_v45, %v480_v48 }
 0x225   : > { %561 = vmax.xlane.f32.xlu1 %v486_v47 }
 0x226   : > { %v1114_v50 = vpop.f32.mrb[4].mxu0  ;;  %559 = vmax.xlane.f32.xlu0 %v481_v49 }
 0x227   : > { %v496_v51 = vadd.f32 %v1114_v50, %v996_v45  ;;  %v490_v52 = vpop.f32.mrb[5].mxu0 }
 0x228   : > { %v491_v54 = vadd.f32 %v996_v45, %v490_v52 }
 0x229   : > { %565 = vmax.xlane.f32.xlu1 %v496_v51 }
 0x22a   : > { %v1117_v53 = vpop.f32.mrb[6].mxu0 }
 0x22b   : > { %v500_v55 = vpop.f32.mrb[7].mxu0  ;;  %v506_v56 = vadd.f32 %v1117_v53, %v996_v45 }
 0x22c   : > { %v501_v60 = vadd.f32 %v996_v45, %v500_v55 }
 0x22d   : > { %563 = vmax.xlane.f32.xlu1 %v491_v54 }
 0x22e   : > { %v1120_v57 = vpop.f32.mrb[8].mxu0 }
 0x22f   : > { %v510_v58 = vpop.f32.mrb[9].mxu0  ;;  %v516_v62 = vadd.f32 %v1120_v57, %v996_v45 }
 0x230   : > { %v511_v3 = vadd.f32 %v996_v45, %v510_v58 }
 0x231   : > { %569 = vmax.xlane.f32.xlu1 %v506_v56 }
 0x232   : > { %v1123_v59 = vpop.f32.mrb[10].mxu0 }
 0x233   : > { %v520_v61 = vpop.f32.mrb[11].mxu0  ;;  %v1729_v5 = vadd.f32 %v1123_v59, %v996_v45 }
 0x234   : > { %v1732_v8 = vadd.f32 %v996_v45, %v520_v61 }
 0x235   : > { %567 = vmax.xlane.f32.xlu1 %v501_v60 }
 0x236   : > { %v1126_v63 = vpop.f32.mrb[12].mxu0 }
 0x237   : > { %v530_v1 = vpop.f32.mrb[13].mxu0  ;;  %v1735_v9 = vadd.f32 %v1126_v63, %v996_v45 }
 0x238   : > { %v1738_v11 = vadd.f32 %v996_v45, %v530_v1 }
 0x239   : > { %573 = vmax.xlane.f32.xlu1 %v516_v62 }
 0x23a   : > { %v1129_v2 = vpop.f32.mrb[14].mxu0 }
 0x23b   : > { %v540_v4 = vpop.f32.mrb[15].mxu0  ;;  %v1741_v12 = vadd.f32 %v1129_v2, %v996_v45 }
 0x23c   : > { %v1744_v13 = vadd.f32 %v996_v45, %v540_v4 }
 0x23d   : > { %571 = vmax.xlane.f32.xlu1 %v511_v3 }
 0x23e   : > { %v1132_v6 = vpop.f32.mrb[16].mxu0 }
 0x23f   : > { %v550_v7 = vpop.f32.mrb[17].mxu0  ;;  %v1749_v15 = vadd.f32 %v1132_v6, %v996_v45 }
 0x240   : > { %v1747_v14 = vadd.f32 %v996_v45, %v550_v7 }
 0x241   : > { %577 = vmax.xlane.f32.xlu1 %v1729_v5 }
 0x245   : > { %575 = vmax.xlane.f32.xlu1 %v1732_v8 }
 0x249   : > { %581 = vmax.xlane.f32.xlu1 %v1735_v9 }
 0x24d   : > { %579 = vmax.xlane.f32.xlu1 %v1738_v11 }
 0x251   : > { %585 = vmax.xlane.f32.xlu1 %v1741_v12 }
 0x255   : > { %583 = vmax.xlane.f32.xlu1 %v1744_v13 }
 0x259   : > { %587 = vmax.xlane.f32.xlu1 %v1747_v14 }
 0x25d   : > { %589 = vmax.xlane.f32.xlu1 %v1749_v15 }
 0x2b2   : > { %v562_v16 = vpop.xlane.xlu1 %561 }
 0x2b3   : > { %v592_v17 = vsub.f32 %v486_v47, %v562_v16  ;;  %v560_v18 = vpop.xlane.xlu0 %559 }
 0x2b4   : > { %v591_v19 = vsub.f32 %v481_v49, %v560_v18 }
 0x2b5   : > { %v609_v20 = vmul.f32 1.442695, %v592_v17 }
 0x2b6   : > { %v566_v21 = vpop.xlane.xlu1 %565  ;;  %v607_v22 = vmul.f32 1.442695, %v591_v19 }
 0x2b7   : > { %1285 = vpow2.f32 %v609_v20  ;;  %v594_v23 = vsub.f32 %v496_v51, %v566_v21 }
 0x2b8   : > { %1287 = vpow2.f32 %v607_v22 }
 0x2b9   : > { %v613_v25 = vmul.f32 1.442695, %v594_v23 }
 0x2ba   : > { %v564_v24 = vpop.xlane.xlu1 %563 }
 0x2bb   : > { %v593_v26 = vsub.f32 %v491_v54, %v564_v24  ;;  %1289 = vpow2.f32 %v613_v25 }
 0x2bd   : > { %v611_v28 = vmul.f32 1.442695, %v593_v26 }
 0x2be   : > { %v570_v27 = vpop.xlane.xlu1 %569 }
 0x2bf   : > { %v596_v29 = vsub.f32 %v506_v56, %v570_v27  ;;  %1291 = vpow2.f32 %v611_v28 }
 0x2c1   : > { %v1753_v30 = vpop.eup %1285  ;;  %v617_v32 = vmul.f32 1.442695, %v596_v29 }
 0x2c2   : > { %641 = vadd.xlane.f32.xlu1 %v1753_v30  ;;  %v568_v31 = vpop.xlane.xlu1 %567  ;;  %v1756_v34 = vpop.eup %1287 }
 0x2c3   : > { %v595_v33 = vsub.f32 %v501_v60, %v568_v31  ;;  %1293 = vpow2.f32 %v617_v32 }
 0x2c5   : > { %v615_v36 = vmul.f32 1.442695, %v595_v33  ;;  %v1759_v38 = vpop.eup %1289 }
 0x2c6   : > { %v574_v35 = vpop.xlane.xlu1 %573  ;;  %639 = vadd.xlane.f32.xlu1 %v1756_v34 }
 0x2c7   : > { %v598_v37 = vsub.f32 %v516_v62, %v574_v35  ;;  %1295 = vpow2.f32 %v615_v36 }
 0x2c9   : > { %v621_v40 = vmul.f32 1.442695, %v598_v37  ;;  %v1762_v42 = vpop.eup %1291 }
 0x2ca   : > { %v572_v39 = vpop.xlane.xlu1 %571  ;;  %645 = vadd.xlane.f32.xlu1 %v1759_v38 }
 0x2cb   : > { %v597_v41 = vsub.f32 %v511_v3, %v572_v39  ;;  %1297 = vpow2.f32 %v621_v40 }
 0x2cd   : > { %v619_v44 = vmul.f32 1.442695, %v597_v41  ;;  %v1766_v46 = vpop.eup %1293 }
 0x2ce   : > { %v578_v43 = vpop.xlane.xlu1 %577  ;;  %643 = vadd.xlane.f32.xlu1 %v1762_v42 }
 0x2cf   : > { %v600_v45 = vsub.f32 %v1729_v5, %v578_v43  ;;  %1299 = vpow2.f32 %v619_v44 }
 0x2d1   : > { %v625_v48 = vmul.f32 1.442695, %v600_v45  ;;  %v1770_v50 = vpop.eup %1295 }
 0x2d2   : > { %v576_v47 = vpop.xlane.xlu1 %575  ;;  %649 = vadd.xlane.f32.xlu1 %v1766_v46 }
 0x2d3   : > { %v599_v49 = vsub.f32 %v1732_v8, %v576_v47  ;;  %1301 = vpow2.f32 %v625_v48 }
 0x2d5   : > { %v623_v52 = vmul.f32 1.442695, %v599_v49  ;;  %v1773_v53 = vpop.eup %1297 }
 0x2d6   : > { %v582_v51 = vpop.xlane.xlu1 %581  ;;  %647 = vadd.xlane.f32.xlu1 %v1770_v50 }
 0x2d7   : > { %v602_v54 = vsub.f32 %v1735_v9, %v582_v51  ;;  %1303 = vpow2.f32 %v623_v52 }
 0x2d9   : > { %v1778_v57 = vpop.eup %1299  ;;  %v629_v59 = vmul.f32 1.442695, %v602_v54 }
 0x2da   : > { %v580_v55 = vpop.xlane.xlu1 %579  ;;  %653 = vadd.xlane.f32.xlu1 %v1773_v53 }
 0x2db   : > { %v601_v56 = vsub.f32 %v1738_v11, %v580_v55 }
 0x2dd   : > { %v627_v58 = vmul.f32 1.442695, %v601_v56  ;;  %v1782_v62 = vpop.eup %1301 }
 0x2de   : > { %v586_v60 = vpop.xlane.xlu1 %585  ;;  %651 = vadd.xlane.f32.xlu1 %v1778_v57 }
 0x2df   : > { %1305 = vpow2.f32 %v627_v58  ;;  %v604_v61 = vsub.f32 %v1741_v12, %v586_v60 }
 0x2e0   : > { %1307 = vpow2.f32 %v629_v59 }
 0x2e1   : > { %v633_v63 = vmul.f32 1.442695, %v604_v61  ;;  %v1786_v3 = vpop.eup %1303 }
 0x2e2   : > { %v584_v1 = vpop.xlane.xlu1 %583  ;;  %657 = vadd.xlane.f32.xlu1 %v1782_v62 }
 0x2e3   : > { %1309 = vpow2.f32 %v633_v63  ;;  %v603_v2 = vsub.f32 %v1744_v13, %v584_v1 }
 0x2e5   : > { %v631_v4 = vmul.f32 1.442695, %v603_v2 }
 0x2e6   : > { %v588_v5 = vpop.xlane.xlu1 %587  ;;  %655 = vadd.xlane.f32.xlu1 %v1786_v3 }
 0x2e7   : > { %1311 = vpow2.f32 %v631_v4  ;;  %v605_v6 = vsub.f32 %v1747_v14, %v588_v5 }
 0x2e9   : > { %v1790_v7 = vpop.eup %1305  ;;  %v635_v8 = vmul.f32 1.442695, %v605_v6 }
 0x2ea   : > { %v590_v9 = vpop.xlane.xlu1 %589  ;;  %659 = vadd.xlane.f32.xlu1 %v1790_v7  ;;  %v1794_v12 = vpop.eup %1307 }
 0x2eb   : > { %1313 = vpow2.f32 %v635_v8  ;;  %v606_v11 = vsub.f32 %v1749_v15, %v590_v9 }
 0x2ed   : > { %v1796_v13 = vpop.eup %1309  ;;  %v637_v16 = vmul.f32 1.442695, %v606_v11 }
 0x2ee   : > { %665 = vadd.xlane.f32.xlu0 %v1796_v13  ;;  %661 = vadd.xlane.f32.xlu1 %v1794_v12 }
 0x2ef   : > { %1315 = vpow2.f32 %v637_v16 }
 0x2f1   : > { %v1800_v14 = vpop.eup %1311 }
 0x2f2   : > { %663 = vadd.xlane.f32.xlu1 %v1800_v14 }
 0x2f5   : > { %v1803_v17 = vpop.eup %1313 }
 0x2f6   : > { %667 = vadd.xlane.f32.xlu1 %v1803_v17 }
 0x2f9   : > { %v1806_v15 = vpop.eup %1315 }
 0x2fa   : > { %669 = vadd.xlane.f32.xlu0 %v1806_v15 }
 0x34f   : > { %v642_v18 = vpop.xlane.xlu1 %641 }
 0x350   : > { %1317 = vrcp.f32 %v642_v18 }
 0x353   : > { %v640_v19 = vpop.xlane.xlu1 %639 }
 0x354   : > { %1319 = vrcp.f32 %v640_v19 }
 0x357   : > { %v646_v20 = vpop.xlane.xlu1 %645 }
 0x358   : > { %1321 = vrcp.f32 %v646_v20 }
 0x35a   : > { %v1318_v21 = vpop.eup %1317 }
 0x35b   : > { %v688_v22 = vmul.f32 %v1318_v21, %v642_v18  ;;  %v644_v23 = vpop.xlane.xlu1 %643 }
 0x35c   : > { %1323 = vrcp.f32 %v644_v23 }
 0x35d   : > { %v704_v24 = vsub.f32 2.0, %v688_v22 }
 0x35e   : > { %v1320_v25 = vpop.eup %1319 }
 0x35f   : > { %v720_v26 = vmul.f32 %v1318_v21, %v704_v24  ;;  %v687_v27 = vmul.f32 %v1320_v25, %v640_v19  ;;  %v650_v28 = vpop.xlane.xlu1 %649 }
 0x360   : > { %1325 = vrcp.f32 %v650_v28 }
 0x361   : > { %v703_v29 = vsub.f32 2.0, %v687_v27  ;;  %v736_v31 = vmul.f32 %v1753_v30, %v720_v26 }
 0x362   : > { %v1322_v32 = vpop.eup %1321 }
 0x363   : > { %v719_v33 = vmul.f32 %v1320_v25, %v703_v29  ;;  %v690_v35 = vmul.f32 %v1322_v32, %v646_v20  ;;  %v648_v36 = vpop.xlane.xlu1 %647  ;;  %752 = vst [vmem:[%s1811_s28 + $0x8] sm:$0xff] %v736_v31 }
 0x364   : > { %1327 = vrcp.f32 %v648_v36 }
 0x365   : > { %v706_v37 = vsub.f32 2.0, %v690_v35  ;;  %v735_v39 = vmul.f32 %v1756_v34, %v719_v33 }
 0x366   : > { %v1324_v40 = vpop.eup %1323 }
 0x367   : > { %v722_v41 = vmul.f32 %v1322_v32, %v706_v37  ;;  %v689_v43 = vmul.f32 %v1324_v40, %v644_v23  ;;  %v654_v44 = vpop.xlane.xlu1 %653  ;;  %751 = vst [vmem:[%s1811_s28] sm:$0xff] %v735_v39  ;;  %v1193_v30 = vpack.c.bf16 %v736_v31, %v735_v39 }
 0x368   : > { %1329 = vrcp.f32 %v654_v44 }
 0x369   : > { %v705_v45 = vsub.f32 2.0, %v689_v43  ;;  %1194 = vmatpush3.bf16.xpose.msra.mxu1 %v1193_v30  ;;  %v738_v47 = vmul.f32 %v1759_v38, %v722_v41 }
 0x36a   : > { %v1326_v48 = vpop.eup %1325  ;;  %1195 = vmatprep.subr.bf16.mxu1 %v1515_v0 }
 0x36b   : > { %v721_v49 = vmul.f32 %v1324_v40, %v705_v45  ;;  %v692_v51 = vmul.f32 %v1326_v48, %v650_v28  ;;  %v652_v52 = vpop.xlane.xlu1 %651  ;;  %754 = vst [vmem:[%s1811_s28 + $0x18] sm:$0xff] %v738_v47 }
 0x36c   : > { %1331 = vrcp.f32 %v652_v52 }
 0x36d   : > { %v708_v34 = vsub.f32 2.0, %v692_v51  ;;  %v737_v54 = vmul.f32 %v1762_v42, %v721_v49 }
 0x36e   : > { %v1328_v55 = vpop.eup %1327 }
 0x36f   : > { %v724_v56 = vmul.f32 %v1326_v48, %v708_v34  ;;  %v691_v58 = vmul.f32 %v1328_v55, %v648_v36  ;;  %v658_v59 = vpop.xlane.xlu1 %657  ;;  %753 = vst [vmem:[%s1811_s28 + $0x10] sm:$0xff] %v737_v54  ;;  %v1196_v60 = vpack.c.bf16 %v738_v47, %v737_v54 }
 0x370   : > { %1333 = vrcp.f32 %v658_v59 }
 0x371   : > { %v707_v38 = vsub.f32 2.0, %v691_v58  ;;  %1197 = vmatpush3.bf16.xpose.msra.mxu1 %v1196_v60  ;;  %v740_v61 = vmul.f32 %v1766_v46, %v724_v56 }
 0x372   : > { %v1330_v63 = vpop.eup %1329  ;;  %1198 = vmatprep.subr.bf16.mxu1 %v1515_v0 }
 0x373   : > { %v723_v1 = vmul.f32 %v1328_v55, %v707_v38  ;;  %v694_v2 = vmul.f32 %v1330_v63, %v654_v44  ;;  %v656_v4 = vpop.xlane.xlu1 %655  ;;  %756 = vst [vmem:[%s1811_s28 + $0x28] sm:$0xff] %v740_v61 }
 0x374   : > { %1335 = vrcp.f32 %v656_v4 }
 0x375   : > { %v710_v42 = vsub.f32 2.0, %v694_v2  ;;  %v739_v5 = vmul.f32 %v1770_v50, %v723_v1 }
 0x376   : > { %v1332_v6 = vpop.eup %1331 }
 0x377   : > { %v726_v8 = vmul.f32 %v1330_v63, %v710_v42  ;;  %v693_v9 = vmul.f32 %v1332_v6, %v652_v52  ;;  %v660_v11 = vpop.xlane.xlu1 %659  ;;  %755 = vst [vmem:[%s1811_s28 + $0x20] sm:$0xff] %v739_v5  ;;  %v1199_v16 = vpack.c.bf16 %v740_v61, %v739_v5 }
 0x378   : > { %1337 = vrcp.f32 %v660_v11 }
 0x379   : > { %v709_v46 = vsub.f32 2.0, %v693_v9  ;;  %1200 = vmatpush3.bf16.xpose.msra.mxu1 %v1199_v16  ;;  %v742_v18 = vmul.f32 %v1773_v53, %v726_v8 }
 0x37a   : > { %v1334_v19 = vpop.eup %1333  ;;  %1201 = vmatprep.subr.bf16.mxu1 %v1515_v0 }
 0x37b   : > { %v725_v20 = vmul.f32 %v1332_v6, %v709_v46  ;;  %v696_v21 = vmul.f32 %v1334_v19, %v658_v59  ;;  %v662_v22 = vpop.xlane.xlu1 %661  ;;  %v666_v50 = vpop.xlane.xlu0 %665  ;;  %758 = vst [vmem:[%s1811_s28 + $0x38] sm:$0xff] %v742_v18 }
 0x37c   : > { %1339 = vrcp.f32 %v662_v22 }
 0x37d   : > { %v712_v23 = vsub.f32 2.0, %v696_v21  ;;  %1341 = vrcp.f32 %v666_v50  ;;  %v741_v24 = vmul.f32 %v1778_v57, %v725_v20 }
 0x37e   : > { %v1336_v25 = vpop.eup %1335 }
 0x37f   : > { %v728_v26 = vmul.f32 %v1334_v19, %v712_v23  ;;  %v695_v27 = vmul.f32 %v1336_v25, %v656_v4  ;;  %v664_v28 = vpop.xlane.xlu1 %663  ;;  %757 = vst [vmem:[%s1811_s28 + $0x30] sm:$0xff] %v741_v24  ;;  %v1202_v53 = vpack.c.bf16 %v742_v18, %v741_v24 }
 0x380   : > { %1343 = vrcp.f32 %v664_v28 }
 0x381   : > { %v711_v29 = vsub.f32 2.0, %v695_v27  ;;  %1203 = vmatpush3.bf16.xpose.msra.mxu1 %v1202_v53  ;;  %v744_v31 = vmul.f32 %v1782_v62, %v728_v26 }
 0x382   : > { %v1338_v32 = vpop.eup %1337  ;;  %1204 = vmatprep.subr.bf16.mxu1 %v1515_v0 }
 0x383   : > { %v727_v33 = vmul.f32 %v1336_v25, %v711_v29  ;;  %v697_v35 = vmul.f32 %v1338_v32, %v660_v11  ;;  %v668_v36 = vpop.xlane.xlu1 %667  ;;  %760 = vst [vmem:[%s1811_s28 + $0x48] sm:$0xff] %v744_v31 }
 0x384   : > { %1345 = vrcp.f32 %v668_v36 }
 0x385   : > { %v713_v57 = vsub.f32 2.0, %v697_v35  ;;  %v743_v37 = vmul.f32 %v1786_v3, %v727_v33 }
 0x386   : > { %v1340_v39 = vpop.eup %1339 }
 0x387   : > { %v1342_v40 = vpop.eup %1341  ;;  %v729_v41 = vmul.f32 %v1338_v32, %v713_v57  ;;  %v698_v43 = vmul.f32 %v1340_v39, %v662_v22  ;;  %v670_v44 = vpop.xlane.xlu0 %669  ;;  %759 = vst [vmem:[%s1811_s28 + $0x40] sm:$0xff] %v743_v37  ;;  %v1205_v30 = vpack.c.bf16 %v744_v31, %v743_v37 }
 0x388   : > { %v700_v62 = vmul.f32 %v1342_v40, %v666_v50  ;;  %1347 = vrcp.f32 %v670_v44 }
 0x389   : > { %v714_v45 = vsub.f32 2.0, %v698_v43  ;;  %1206 = vmatpush3.bf16.xpose.msra.mxu1 %v1205_v30  ;;  %v745_v47 = vmul.f32 %v1790_v7, %v729_v41 }
 0x38a   : > { %v1344_v48 = vpop.eup %1343  ;;  %v716_v49 = vsub.f32 2.0, %v700_v62  ;;  %1207 = vmatprep.subr.bf16.mxu1 %v1515_v0 }
 0x38b   : > { %v730_v3 = vmul.f32 %v1340_v39, %v714_v45  ;;  %v699_v51 = vmul.f32 %v1344_v48, %v664_v28  ;;  %761 = vst [vmem:[%s1811_s28 + $0x50] sm:$0xff] %v745_v47 }
 0x38c   : > { %v732_v52 = vmul.f32 %v1342_v40, %v716_v49 }
 0x38d   : > { %v715_v34 = vsub.f32 2.0, %v699_v51  ;;  %v746_v54 = vmul.f32 %v1794_v12, %v730_v3 }
 0x38e   : > { %v1346_v55 = vpop.eup %1345  ;;  %v748_v56 = vmul.f32 %v1796_v13, %v732_v52 }
 0x38f   : > { %v731_v58 = vmul.f32 %v1344_v48, %v715_v34  ;;  %v701_v59 = vmul.f32 %v1346_v55, %v668_v36  ;;  %762 = vst [vmem:[%s1811_s28 + $0x58] sm:$0xff] %v746_v54  ;;  %v1208_v7 = vpack.c.bf16 %v746_v54, %v745_v47 }
 0x390   : > { %764 = vst [vmem:[%s1811_s28 + $0x68] sm:$0xff] %v748_v56 }
 0x391   : > { %v717_v60 = vsub.f32 2.0, %v701_v59  ;;  %1209 = vmatpush3.bf16.xpose.msra.mxu1 %v1208_v7  ;;  %v747_v38 = vmul.f32 %v1800_v14, %v731_v58 }
 0x392   : > { %v1348_v61 = vpop.eup %1347  ;;  %1210 = vmatprep.subr.bf16.mxu1 %v1515_v0 }
 0x393   : > { %v733_v63 = vmul.f32 %v1346_v55, %v717_v60  ;;  %v702_v12 = vmul.f32 %v1348_v61, %v670_v44  ;;  %763 = vst [vmem:[%s1811_s28 + $0x60] sm:$0xff] %v747_v38  ;;  %v1211_v4 = vpack.c.bf16 %v748_v56, %v747_v38 }
 0x395   : > { %v749_v13 = vmul.f32 %v1803_v17, %v733_v63  ;;  %v718_v1 = vsub.f32 2.0, %v702_v12 }
 0x397   : > { %765 = vst [vmem:[%s1811_s28 + $0x70] sm:$0xff] %v749_v13  ;;  %v734_v2 = vmul.f32 %v1348_v61, %v718_v1 }
 0x399   : > { %v750_v42 = vmul.f32 %v1806_v15, %v734_v2  ;;  %1212 = vmatpush3.bf16.xpose.msra.mxu1 %v1211_v4 }
 0x39a   : > { %1213 = vmatprep.subr.bf16.mxu1 %v1515_v0 }
 0x39b   : > { %766 = vst [vmem:[%s1811_s28 + $0x78] sm:$0xff] %v750_v42  ;;  %v1214_v14 = vpack.c.bf16 %v750_v42, %v749_v13 }
 0x3a1   : > { %1215 = vmatpush3.bf16.xpose.msra.mxu1 %v1214_v14 }
 0x3a8   : > { %1166 = vmatmul.mubr.f32.vlgmr.msra.gmra.mrb[0].mxu1 %v1700_v10 }
 0x3a9   : > { %1420 = shalt.err (!%p1417_p7)
}
 0x3aa   : > { %s1421_s13 = scalar_lea.hbm %s1857_s6, 2048  ;;  %s1425_s9 = scalar_lea.hbm %s1939_s4, 4096 }
 0x3ab   : > { %p1422_p9 = scmp.ne.s32.totalorder %s1857_s6, %s1421_s13  ;;  %p1426_p0 = scmp.lt.u32.totalorder %s1857_s6, %s1939_s4 }
 0x3ac   : > { %p1427_p11 = scmp.lt.u32.totalorder %s1425_s9, %s1421_s13  ;;  %p1429_p4 = scmp.lt.u32.totalorder %s1421_s13, %s1857_s6 }
 0x3ad   : > { %p1423_p2 = pnand %p1422_p9, %p1638_p12 }
 0x3ae   : > { %p1428_p1 = por %p1427_p11, %p1426_p0 }
 0x3af   : > { %p1424_p5 = pneg %p1423_p2 }
 0x3b0   : > { %p1430_p6 = por %p1429_p4, %p1428_p1 }
 0x3b2   : > { %p1431_p8 = pnand %p1430_p6, %p1424_p5 }
 0x3b4   : > { %1434 = shalt.err (!%p1431_p8)
}
 0x3b5   : > { %s1519_s14 = smov 128   ;;  %s1520_s20 = smov 8  }
 0x3b6   : > { %1223 = dma.vmem_to_hbm [thread:$0]  (%p1638_p12), %s1859_s10, 2048, %s1857_s6, %s844_s5, %s1519_s14, %s1519_s14, %s1520_s20  }
 0x3b7   : > { %s231_s7 = scalar_lea.vmem [#allocation7], %s992_s11  ;;  %s1015_s8 = sshll.u32 %s1568_s19, 7 }
 0x3b8   : > { %s857_s26 = sshll.u32 %s231_s7, 4  ;;  %s1893_s21 = scalar_lea.hbm %s1938_s3, %s1015_s8  ;;  %s1888_s26 = int_to_ptr.vmem [resolvable:$true] %s857_s26 }
 0x3b9   : > { %s839_s23 = scalar_lea.sflag [#allocation4], %s1683_s25  ;;  %s1435_s9 = scalar_lea.vmem %s1888_s26, 128 }
 0x3ba   : > { %p1436_p10 = scmp.ne.s32.totalorder %s1888_s26, %s1435_s9  ;;  %s1521_s19 = smov [#allocation7]  }
 0x3bb   : > { %s1439_s11 = sshll.u32 %s1521_s19, 4  ;;  %s1440_s11 = int_to_ptr.vmem [resolvable:$false] %s1439_s11 }
 0x3bc   : > { %p1437_p13 = pnand %p1436_p10, %p1638_p12  ;;  %s1441_s10 = scalar_lea.vmem %s1440_s11, 256 }
 0x3bd   : > { %p1442_p7 = scmp.lt.s32.totalorder %s1888_s26, %s1440_s11  ;;  %p1443_p9 = scmp.lt.s32.totalorder %s1441_s10, %s1435_s9 }
 0x3be   : > { %p1438_p3 = pneg %p1437_p13 }
 0x3bf   : > { %p1444_p2 = por %p1443_p9, %p1442_p7 }
 0x3c1   : > { %p1445_p5 = pnand %p1444_p2, %p1438_p3 }
 0x47b   : > { %v833_v0 = vpop.f32.mrb[0].mxu1 }
 0x47c   : > { %837 = vst [vmem:[%s231_s7] sm:$0xff] %v833_v0  ;;  %v1167_v10 = vpop.f32.mrb[1].mxu1 }
 0x47d   : > { %1448 = shalt.err (!%p1445_p5)
}
 0x47e   : > { %s1449_s25 = scalar_lea.hbm %s1893_s21, 128  ;;  %s1453_s28 = scalar_lea.hbm %s1938_s3, 256 }
 0x47f   : > { %p1450_p0 = scmp.ne.s32.totalorder %s1893_s21, %s1449_s25  ;;  %p1454_p4 = scmp.lt.u32.totalorder %s1893_s21, %s1938_s3 }
 0x480   : > { %p1455_p6 = scmp.lt.u32.totalorder %s1453_s28, %s1449_s25  ;;  %p1457_p10 = scmp.lt.u32.totalorder %s1449_s25, %s1893_s21 }
 0x481   : > { %p1451_p11 = pnand %p1450_p0, %p1638_p12 }
 0x482   : > { %p1456_p8 = por %p1455_p6, %p1454_p4 }
 0x483   : > { %p1452_p1 = pneg %p1451_p11 }
 0x484   : > { %p1458_p13 = por %p1457_p10, %p1456_p8 }
 0x486   : > { %p1459_p3 = pnand %p1458_p13, %p1452_p1 }
 0x488   : > { %1462 = shalt.err (!%p1459_p3)
}
 0x489   : > { %1222 = dma.vmem_to_hbm [thread:$0]  (%p1638_p12), %s1888_s26, 128, %s1893_s21, %s839_s23  }
 0x48a PF: > { %s885_s20 = sand.u32 1, %s1497_s15   ;;  %p1954_p7 = scmp.ne.s32.totalorder %s1944_s22, 0 }
 0x48b   : > { %p1955_p9 = scmp.ge.s32.totalorder %s1509_s18, 2  ;;  %s886_s7 = scalar_lea.sflag [#allocation4], %s885_s20 }
 0x48d   : > { %p1235_p2 = pnand %p1955_p9, %p1954_p7 }
 0x48f   : > { %1488 = dma.done.wait (!%p1235_p2), %s886_s7, 128  }
 0x490   : > { %1490 = vsyncadd (!%p1235_p2), %s886_s7, 4294967168  ;;  %s895_s8 = scalar_lea.sflag [#allocation9], %s885_s20 }
 0x491   : > { %1492 = dma.done.wait (!%p1235_p2), %s895_s8, 2048  }
 0x492   : > { %1494 = vsyncadd (!%p1235_p2), %s895_s8, 4294965248  ;;  %p22_p12 = scmp.ge.s32.totalorder %s1603_s27, 4   ;;  %s1956_s15 = smov %s1501_s16 }
 0x493   : > { %s1957_s16 = smov %s1505_s17  ;;  %s1958_s17 = smov %s1634_s24 }
 0x494   : > { %s1959_s18 = smov %s1603_s27  ;;  %24 = sbr.rel (!%p22_p12) target bundleno = 8 (0x8), region = 98 }
 0x49b   :  { %900 = vsyncpa [#allocation3], 1 }
 0x49c   :  { %902 = vsyncpa [#allocation3 + $0x1], 1 }
 0x49d   :  { %903 = vsyncpa [#allocation6], 1 }
 0x49e   :  { %904 = vsyncpa [#allocation4], 1 }
 0x49f   :  { %906 = vsyncpa [#allocation4 + $0x1], 1 }
 0x4a0   :  { %907 = vsyncpa [#allocation9], 1 }
 0x4a1   :  { %909 = vsyncpa [#allocation9 + $0x1], 1 }

</bundles_post_ra>
